<compile_context>
chip_gen: v7x
topology: tpu7x:2x2x1
jax: 0.10.0
libtpu: 0.0.40
codegen_flags: <defaults>
</compile_context>

<pallas_src>
import math
import functools

import jax
import jax.numpy as jnp
from jax.experimental import pallas as pl
from jax.experimental.pallas import tpu as pltpu


# --------------------------------------------------------------------------- #
# constants / small helpers
# --------------------------------------------------------------------------- #

_NEG_BIG = -1e9                    # finite "-inf" for additive attention masks
_LANE = 128
_COMPUTE_DTYPE = jnp.bfloat16      # MXU operand dtype; accumulation is f32


def _round_up(x, m):
    return ((x + m - 1) // m) * m


def _pad_row(v, n):
    """1-D (d,) -> zero-padded (1, n) float32 row."""
    v = jnp.asarray(v).reshape(1, -1).astype(jnp.float32)
    return jnp.pad(v, ((0, 0), (0, n - v.shape[1])))


def _default_vmem_limit():
    """~3/4 of the chip's VMEM: ~96 MiB on v5e/v6e (128 MiB), ~48 MiB on v7x
    (64 MiB per TC).  Falls back to 64 MiB if the query is unavailable."""
    try:
        cap = int(pltpu.get_tpu_info().vmem_capacity_bytes)
        return max(32 * 1024 * 1024, min(3 * cap // 4, 100 * 1024 * 1024))
    except Exception:   # pragma: no cover - defensive
        return 64 * 1024 * 1024


def _masked_layer_norm(x, g, b, d_true, eps=1e-5):
    """LayerNorm over the first `d_true` lanes of a zero-padded (rows, D_pad)
    tile.  Two-pass, lane-masked (x-mu)^2 variance (better conditioned than
    E[x^2]-E[x]^2).  g/b are zero-padded so padded output lanes stay zero."""
    d_pad = x.shape[-1]
    if d_pad == d_true:
        mu = jnp.mean(x, axis=-1, keepdims=True)
        xc = x - mu
        var = jnp.mean(xc * xc, axis=-1, keepdims=True)
    else:
        lane = jax.lax.broadcasted_iota(jnp.int32, (1, d_pad), 1)
        lmask = (lane < d_true).astype(x.dtype)
        mu = jnp.sum(x, axis=-1, keepdims=True) / d_true
        xc = (x - mu) * lmask
        var = jnp.sum(xc * xc, axis=-1, keepdims=True) / d_true
    inv = jax.lax.rsqrt(var + eps)
    return (x - mu) * inv * g + b


# --------------------------------------------------------------------------- #
# kernel 1: fused QKV projection (once per row per layer)
# --------------------------------------------------------------------------- #

def qkv_proj_kernel(x_ref, spk_ref, wqkv_ref, bqkv_ref, q_ref, k_ref, v_ref,
                    *, nhead, dh, dh_p, scale):
    f32 = jnp.float32
    cd = _COMPUTE_DTYPE
    ts = x_ref.shape[1]
    Hdh = nhead * dh

    h = x_ref[0].astype(f32) + spk_ref[0]                         # (ts, D_pad)
    qkv = jnp.dot(h.astype(cd), wqkv_ref[...],
                  preferred_element_type=f32) + bqkv_ref[...]     # (ts, C_pad)

    zeros_pad = None
    if dh_p > dh:
        zeros_pad = jnp.zeros((ts, dh_p - dh), f32)

    def split_heads(cols):
        # (ts, H*dh) dense matmul output -> (H, ts, dh_p) head-major, padded.
        parts = []
        for hh in range(nhead):
            p = cols[:, hh * dh:(hh + 1) * dh]
            if zeros_pad is not None:
                p = jnp.concatenate([p, zeros_pad], axis=-1)
            parts.append(p)
        return jnp.stack(parts, axis=0)

    # fold the 1/sqrt(head_dim) softmax scale into Q once, here.
    q = split_heads(qkv[:, :Hdh]) * scale
    k = split_heads(qkv[:, Hdh:2 * Hdh])
    v = split_heads(qkv[:, 2 * Hdh:3 * Hdh])

    q_ref[...] = q[None].astype(q_ref.dtype)
    k_ref[...] = k[None].astype(k_ref.dtype)
    v_ref[...] = v[None].astype(v_ref.dtype)


def _run_qkv_proj(x_p, spk_emb, wqkv_p, bqkv_p, *, nhead, dh, dh_p, ts,
                  vmem_limit):
    B, S_pad, D_pad = x_p.shape
    C_pad = wqkv_p.shape[1]
    nS = S_pad // ts
    scale = 1.0 / math.sqrt(dh)

    kernel = functools.partial(qkv_proj_kernel, nhead=nhead, dh=dh, dh_p=dh_p,
                               scale=scale)

    qkv_shape = jax.ShapeDtypeStruct((B, nhead, S_pad, dh_p), _COMPUTE_DTYPE)
    wmap = lambda b, si: (0, 0)
    w_spec = lambda w: pl.BlockSpec(w.shape, wmap,
                                    pipeline_mode=pl.Buffered(1))
    out_spec = pl.BlockSpec((1, nhead, ts, dh_p), lambda b, si: (b, 0, si, 0))

    cost = pl.CostEstimate(
        flops=int(2 * B * S_pad * D_pad * C_pad),
        transcendentals=0,
        bytes_accessed=int(x_p.size * x_p.dtype.itemsize
                           + 3 * B * nhead * S_pad * dh_p * 2
                           + wqkv_p.size * 2 + bqkv_p.size * 4
                           + spk_emb.size * 4))

    return pl.pallas_call(
        kernel,
        out_shape=(qkv_shape, qkv_shape, qkv_shape),
        grid_spec=pltpu.PrefetchScalarGridSpec(
            num_scalar_prefetch=0,
            grid=(B, nS),
            in_specs=[
                pl.BlockSpec((1, ts, D_pad), lambda b, si: (b, si, 0)),
                pl.BlockSpec((1, 1, D_pad), lambda b, si: (b, 0, 0)),
                w_spec(wqkv_p),
                w_spec(bqkv_p),
            ],
            out_specs=(out_spec, out_spec, out_spec)),
        compiler_params=pltpu.CompilerParams(
            dimension_semantics=("parallel", "parallel"),
            vmem_limit_bytes=vmem_limit),
        cost_estimate=cost,
    )(x_p, spk_emb, wqkv_p, bqkv_p)


# --------------------------------------------------------------------------- #
# kernel 2: flash attention + out-proj + add&norm + FFN + add&norm (+final LN)
# --------------------------------------------------------------------------- #

def attn_ffn_kernel(*refs, nhead, dh_p, d_true, seq_len,
                    have_mask, have_kpm, need_seq_mask, apply_final_norm):
    f32 = jnp.float32
    cd = _COMPUTE_DTYPE

    it = iter(refs)
    x_ref = next(it); spk_ref = next(it)
    q_ref = next(it); k_ref = next(it); v_ref = next(it)
    mask_ref = next(it) if have_mask else None
    kpm_ref = next(it) if have_kpm else None
    wo_ref = next(it); bo_ref = next(it)
    w1_ref = next(it); b1_ref = next(it)
    w2_ref = next(it); b2_ref = next(it)
    g1_ref = next(it); be1_ref = next(it)
    g2_ref = next(it); be2_ref = next(it)
    if apply_final_norm:
        gf_ref = next(it); bf_ref = next(it)
    o_ref = next(it)
    m_sc = next(it); l_sc = next(it); acc_sc = next(it)

    ki = pl.program_id(2)
    nk = pl.num_programs(2)
    tq = q_ref.shape[2]
    tk = k_ref.shape[2]
    Hdh_p = nhead * dh_p

    @pl.when(ki == 0)
    def _init():
        m_sc[...] = jnp.full_like(m_sc, -jnp.inf)
        l_sc[...] = jnp.zeros_like(l_sc)
        acc_sc[...] = jnp.zeros_like(acc_sc)

    # scores; Q was pre-scaled by 1/sqrt(dh) in the projection kernel.
    s = jnp.einsum('hqd,hkd->hqk', q_ref[0], k_ref[0],
                   preferred_element_type=f32)                  # (H, tq, tk)

    # additive biases -- all static-flag gated; nothing is streamed when unused
    if have_mask and have_kpm:
        s = s + (mask_ref[...] + kpm_ref[0])[None, :, :]
    elif have_mask:
        s = s + mask_ref[...][None, :, :]
    elif have_kpm:
        s = s + kpm_ref[0][None, :, :]
    if need_seq_mask:
        # sequence padding mask generated in-kernel (no HBM bias array).
        keypos = ki * tk + jax.lax.broadcasted_iota(jnp.int32, (1, tk), 1)
        s = s + jnp.where(keypos < seq_len, 0.0, _NEG_BIG)[None, :, :]

    m_prev = m_sc[...]
    m_new = jnp.maximum(m_prev, jnp.max(s, axis=-1, keepdims=True))
    alpha = jnp.exp(m_prev - m_new)
    p = jnp.exp(s - m_new)
    l_sc[...] = alpha * l_sc[...] + jnp.sum(p, axis=-1, keepdims=True)
    acc_sc[...] = alpha * acc_sc[...] + jnp.einsum(
        'hqk,hkd->hqd', p.astype(cd), v_ref[0], preferred_element_type=f32)
    m_sc[...] = m_new

    @pl.when(ki == nk - 1)
    def _finalize():
        attn = acc_sc[...] * pl.reciprocal(l_sc[...], approx=True)  # (H,tq,dh_p)
        attn2 = jnp.swapaxes(attn, 0, 1).reshape(tq, Hdh_p)
        attn_o = jnp.dot(attn2.astype(cd), wo_ref[...],
                         preferred_element_type=f32) + bo_ref[...]  # (tq,D_pad)
        h = x_ref[0].astype(f32) + spk_ref[0]        # residual (recomputed)
        y = _masked_layer_norm(h + attn_o, g1_ref[...], be1_ref[...], d_true)
        ff = jnp.dot(y.astype(cd), w1_ref[...],
                     preferred_element_type=f32) + b1_ref[...]
        ff = jnp.maximum(ff, 0.0)
        ff = jnp.dot(ff.astype(cd), w2_ref[...],
                     preferred_element_type=f32) + b2_ref[...]
        y = _masked_layer_norm(y + ff, g2_ref[...], be2_ref[...], d_true)
        if apply_final_norm:     # static: fused final LayerNorm (last layer)
            y = _masked_layer_norm(y, gf_ref[...], bf_ref[...], d_true)
        o_ref[...] = y[None].astype(o_ref.dtype)


def _run_attn_ffn(x_p, spk_emb, q, k, v, mask_bias, kpm_bias, attn_params,
                  final_norm, *, nhead, dh_p, d_true, seq_len, tq, tk,
                  out_dtype, vmem_limit):
    B, S_pad, D_pad = x_p.shape
    nq, nk = S_pad // tq, S_pad // tk
    have_mask = mask_bias is not None
    have_kpm = kpm_bias is not None
    need_seq_mask = (seq_len < S_pad) and not have_mask and not have_kpm
    apply_final_norm = final_norm is not None
    F_pad = attn_params[2].shape[1]

    inputs = [x_p, spk_emb, q, k, v]
    data_specs = [
        pl.BlockSpec((1, tq, D_pad), lambda b, qi, ki: (b, qi, 0)),
        pl.BlockSpec((1, 1, D_pad), lambda b, qi, ki: (b, 0, 0)),
        pl.BlockSpec((1, nhead, tq, dh_p), lambda b, qi, ki: (b, 0, qi, 0)),
        pl.BlockSpec((1, nhead, tk, dh_p), lambda b, qi, ki: (b, 0, ki, 0)),
        pl.BlockSpec((1, nhead, tk, dh_p), lambda b, qi, ki: (b, 0, ki, 0)),
    ]
    if have_mask:
        inputs.append(mask_bias)
        data_specs.append(pl.BlockSpec((tq, tk), lambda b, qi, ki: (qi, ki)))
    if have_kpm:
        inputs.append(kpm_bias)
        data_specs.append(pl.BlockSpec((1, 1, tk), lambda b, qi, ki: (b, 0, ki)))

    weights = list(attn_params)
    if apply_final_norm:
        weights += list(final_norm)
    wmap = lambda b, qi, ki: (0, 0)
    # constant blocks -> single-buffered (no double-buffer VMEM cost).
    w_specs = [pl.BlockSpec(w.shape, wmap, pipeline_mode=pl.Buffered(1))
               for w in weights]

    kernel = functools.partial(
        attn_ffn_kernel, nhead=nhead, dh_p=dh_p, d_true=d_true,
        seq_len=seq_len, have_mask=have_mask, have_kpm=have_kpm,
        need_seq_mask=need_seq_mask, apply_final_norm=apply_final_norm)

    Hdh_p = nhead * dh_p
    flops = (4 * B * nhead * S_pad * S_pad * dh_p      # QK^T and PV
             + 2 * B * S_pad * Hdh_p * D_pad           # output projection
             + 4 * B * S_pad * D_pad * F_pad)          # FFN
    bytes_accessed = (x_p.size * x_p.dtype.itemsize
                      + q.size * 2 + nq * (k.size + v.size) * 2
                      + B * S_pad * D_pad * jnp.dtype(out_dtype).itemsize
                      + sum(int(w.size) * w.dtype.itemsize for w in weights))
    cost = pl.CostEstimate(flops=int(flops),
                           transcendentals=int(B * nhead * S_pad * S_pad),
                           bytes_accessed=int(bytes_accessed))

    return pl.pallas_call(
        kernel,
        out_shape=jax.ShapeDtypeStruct((B, S_pad, D_pad), out_dtype),
        grid_spec=pltpu.PrefetchScalarGridSpec(
            num_scalar_prefetch=0,
            grid=(B, nq, nk),
            in_specs=data_specs + w_specs,
            out_specs=pl.BlockSpec((1, tq, D_pad), lambda b, qi, ki: (b, qi, 0)),
            scratch_shapes=[
                pltpu.VMEM((nhead, tq, 1), jnp.float32),       # running max
                pltpu.VMEM((nhead, tq, 1), jnp.float32),       # running sum
                pltpu.VMEM((nhead, tq, dh_p), jnp.float32),    # output accum
            ]),
        compiler_params=pltpu.CompilerParams(
            dimension_semantics=("parallel", "parallel", "arbitrary"),
            vmem_limit_bytes=vmem_limit),
        cost_estimate=cost,
    )(*inputs, *weights)


# --------------------------------------------------------------------------- #
# parameter padding / fusion
# --------------------------------------------------------------------------- #

def _prepare_layer_params(params, d_model, nhead, d_ff, D_pad, dh_p, F_pad,
                          C_pad):
    (wspk, bspk, wq, bq, wk, bk, wv, bv, wo, bo,
     w1, b1, w2, b2, g1, be1, g2, be2) = params
    dh = d_model // nhead
    wdt = _COMPUTE_DTYPE

    # Dense fused QKV weight: (D_pad, C_pad), true columns 3*d_model.
    wqkv = jnp.concatenate([wq, wk, wv], axis=1)
    wqkv_p = jnp.pad(wqkv, ((0, D_pad - d_model),
                            (0, C_pad - 3 * d_model))).astype(wdt)
    bqkv_p = _pad_row(jnp.concatenate([bq, bk, bv]), C_pad)

    # Out-projection rows placed at dh_p-aligned per-head offsets (zero rows in
    # the padding) so it consumes the padded (tq, H*dh_p) attention output.
    wo_p = jnp.pad(wo.reshape(nhead, dh, d_model),
                   ((0, 0), (0, dh_p - dh), (0, D_pad - d_model)))
    wo_p = wo_p.reshape(nhead * dh_p, D_pad).astype(wdt)

    attn_params = (
        wo_p, _pad_row(bo, D_pad),
        jnp.pad(w1, ((0, D_pad - d_model), (0, F_pad - d_ff))).astype(wdt),
        _pad_row(b1, F_pad),
        jnp.pad(w2, ((0, F_pad - d_ff), (0, D_pad - d_model))).astype(wdt),
        _pad_row(b2, D_pad),
        _pad_row(g1, D_pad), _pad_row(be1, D_pad),
        _pad_row(g2, D_pad), _pad_row(be2, D_pad),
    )
    return (wspk, bspk), (wqkv_p, bqkv_p), attn_params


# --------------------------------------------------------------------------- #
# full encoder forward
# --------------------------------------------------------------------------- #

def custom_transformer_encoder(src_sbd, spk, layer_params, final_norm_params,
                               nhead, mask=None, src_key_padding_mask=None,
                               tile_s=None, activation_dtype=jnp.bfloat16,
                               vmem_limit_bytes=None):
    """src_sbd: (S, B, D) seq-first (PyTorch convention); spk: (B, Dspk)."""
    S, B, D = src_sbd.shape
    assert D % nhead == 0
    dh = D // nhead

    S_pad = _round_up(S, _LANE)
    if tile_s is None:
        # 256-tiles better fill the 2x256x256 MXU on v6e/v7x; 128 elsewhere.
        tile_s = 256 if (S >= 256 and S_pad % 256 == 0) else 128
    if S_pad % tile_s != 0:
        tile_s = 128
    if tile_s > 128 and B * (S_pad // tile_s) < 2:
        tile_s = 128          # keep both v7x TensorCores busy (B*nq >= 2)
    tq = tk = ts = min(tile_s, S_pad)

    D_pad = _round_up(D, _LANE)
    dh_p = _round_up(dh, _LANE)
    C_pad = _round_up(3 * D, _LANE)

    if vmem_limit_bytes is None:
        vmem_limit_bytes = _default_vmem_limit()

    # activations are stored between layers in bf16 (halves HBM traffic).
    x = jnp.transpose(src_sbd, (1, 0, 2))
    x_p = jnp.pad(x.astype(jnp.float32),
                  ((0, 0), (0, S_pad - S), (0, D_pad - D))).astype(
                      activation_dtype)

    # additive biases are only materialized when actually needed.
    mask_bias = None
    if mask is not None:
        if mask.dtype == jnp.bool_:
            mb = jnp.where(mask, _NEG_BIG, 0.0).astype(jnp.float32)
        else:
            mb = mask.astype(jnp.float32)
        mask_bias = jnp.zeros((S_pad, S_pad), jnp.float32)
        mask_bias = mask_bias.at[:S, :S].set(mb)
        if S_pad > S:
            mask_bias = mask_bias.at[:, S:].set(_NEG_BIG)

    kpm_bias = None
    if src_key_padding_mask is not None:
        kp = jnp.pad(src_key_padding_mask.astype(bool),
                     ((0, 0), (0, S_pad - S)), constant_values=True)
        kpm_bias = jnp.where(kp, _NEG_BIG, 0.0).astype(
            jnp.float32).reshape(B, 1, S_pad)

    n_layers = len(layer_params)
    for li, params in enumerate(layer_params):
        d_ff = params[10].shape[1]                     # w1: (d_model, d_ff)
        F_pad = _round_up(d_ff, _LANE)
        (wspk, bspk), (wqkv_p, bqkv_p), attn_params = _prepare_layer_params(
            params, D, nhead, d_ff, D_pad, dh_p, F_pad, C_pad)

        # speaker conditioning: tiny (B,Dspk)x(Dspk,D) matmul, done once in the
        # wrapper (an M=B matmul would waste the MXU inside the kernel).
        spk_emb = (spk.astype(jnp.float32) @ wspk.astype(jnp.float32)
                   + bspk.astype(jnp.float32))
        spk_emb = jnp.pad(spk_emb, ((0, 0), (0, D_pad - D))).reshape(B, 1, D_pad)

        q, k_, v_ = _run_qkv_proj(x_p, spk_emb, wqkv_p, bqkv_p,
                                  nhead=nhead, dh=dh, dh_p=dh_p, ts=ts,
                                  vmem_limit=vmem_limit_bytes)

        is_last = li == n_layers - 1
        fn = None
        if is_last and final_norm_params is not None:
            fn = (_pad_row(final_norm_params[0], D_pad),
                  _pad_row(final_norm_params[1], D_pad))
        out_dtype = src_sbd.dtype if is_last else activation_dtype
        x_p = _run_attn_ffn(x_p, spk_emb, q, k_, v_, mask_bias, kpm_bias,
                            attn_params, fn,
                            nhead=nhead, dh_p=dh_p, d_true=D, seq_len=S,
                            tq=tq, tk=tk, out_dtype=out_dtype,
                            vmem_limit=vmem_limit_bytes)

    out = x_p[:, :S, :D].astype(src_sbd.dtype)
    return jnp.transpose(out, (1, 0, 2))


# --------------------------------------------------------------------------- #
# parameter init + pure-JAX reference (same assumed layer semantics)
# --------------------------------------------------------------------------- #

def init_layer_params(key, d_model, d_ff, d_spk):
    ks = jax.random.split(key, 7)

    def w(k, shape):
        return jax.random.normal(k, shape, jnp.float32) * 0.02

    z = lambda n: jnp.zeros((n,), jnp.float32)
    return (
        w(ks[0], (d_spk, d_model)), z(d_model),          # spk projection
        w(ks[1], (d_model, d_model)), z(d_model),        # Wq, bq
        w(ks[2], (d_model, d_model)), z(d_model),        # Wk, bk
        w(ks[3], (d_model, d_model)), z(d_model),        # Wv, bv
        w(ks[4], (d_model, d_model)), z(d_model),        # out proj
        w(ks[5], (d_model, d_ff)), z(d_ff),              # linear1
        w(ks[6], (d_ff, d_model)), z(d_model),           # linear2
        jnp.ones((d_model,), jnp.float32), z(d_model),   # norm1
        jnp.ones((d_model,), jnp.float32), z(d_model),   # norm2
    )


def _reference_encoder(src_sbd, spk, layer_params, final_norm_params, nhead,
                       mask=None, src_key_padding_mask=None):
    x = jnp.transpose(src_sbd, (1, 0, 2)).astype(jnp.float32)
    B, S, D = x.shape
    dh = D // nhead

    bias = jnp.zeros((B, 1, S, S), jnp.float32)
    if mask is not None:
        mb = (jnp.where(mask, _NEG_BIG, 0.0) if mask.dtype == jnp.bool_
              else mask.astype(jnp.float32))
        bias = bias + mb[None, None, :, :]
    if src_key_padding_mask is not None:
        bias = bias + jnp.where(src_key_padding_mask, _NEG_BIG,
                                0.0)[:, None, None, :]

    def ln(v, g, b, eps=1e-5):
        mu = jnp.mean(v, -1, keepdims=True)
        var = jnp.mean((v - mu) ** 2, -1, keepdims=True)
        return (v - mu) / jnp.sqrt(var + eps) * g + b

    for (wspk, bspk, wq, bq, wk, bk, wv, bv, wo, bo,
         w1, b1, w2, b2, g1, be1, g2, be2) in layer_params:
        h = x + (spk @ wspk + bspk)[:, None, :]
        q = (h @ wq + bq).reshape(B, S, nhead, dh).transpose(0, 2, 1, 3)
        k = (h @ wk + bk).reshape(B, S, nhead, dh).transpose(0, 2, 1, 3)
        v = (h @ wv + bv).reshape(B, S, nhead, dh).transpose(0, 2, 1, 3)
        s = jnp.einsum('bhqd,bhkd->bhqk', q, k) / math.sqrt(dh) + bias
        p = jax.nn.softmax(s, axis=-1)
        a = jnp.einsum('bhqk,bhkd->bhqd', p, v)
        a = a.transpose(0, 2, 1, 3).reshape(B, S, D) @ wo + bo
        y = ln(h + a, g1, be1)
        f = jnp.maximum(y @ w1 + b1, 0.0) @ w2 + b2
        x = ln(y + f, g2, be2)
    if final_norm_params is not None:
        x = ln(x, final_norm_params[0], final_norm_params[1])
    return jnp.transpose(x, (1, 0, 2))


# --------------------------------------------------------------------------- #
# main
# --------------------------------------------------------------------------- #

if __name__ == "__main__":
    SEQ, BATCH, D_MODEL, NHEAD, D_FF, D_SPK = 8, 2, 32, 4, 64, 16
    NUM_LAYERS = 2

    key = jax.random.PRNGKey(0)
    k_src, k_spk, *k_layers = jax.random.split(key, 2 + NUM_LAYERS)

    src = jax.random.normal(k_src, (SEQ, BATCH, D_MODEL), jnp.float32)
    spk = jax.random.normal(k_spk, (BATCH, D_SPK), jnp.float32)

    layer_params = [init_layer_params(k, D_MODEL, D_FF, D_SPK)
                    for k in k_layers]
    final_norm_params = (jnp.ones((D_MODEL,), jnp.float32),
                         jnp.zeros((D_MODEL,), jnp.float32))

    # ---- no-mask fast path (no attention-bias arrays are streamed) --------
    out = custom_transformer_encoder(src, spk, layer_params, final_norm_params,
                                     NHEAD, mask=None,
                                     src_key_padding_mask=None)
    out = jax.block_until_ready(out)
    assert out.shape == (SEQ, BATCH, D_MODEL)
    assert bool(jnp.all(jnp.isfinite(out)))
    ref = _reference_encoder(src, spk, layer_params, final_norm_params, NHEAD)
    err = float(jnp.max(jnp.abs(out - ref)))
    # bf16 matmuls, bf16 inter-layer activations and the approx softmax
    # reciprocal bound the error (inference-grade accuracy).
    assert err < 6e-2, f"no-mask path: max abs error vs reference: {err}"

    # ---- masked path (bool src_mask + key-padding mask) --------------------
    causal = jnp.triu(jnp.ones((SEQ, SEQ), jnp.int32), k=1).astype(bool)
    kpm = jnp.zeros((BATCH, SEQ), bool).at[1, SEQ - 2:].set(True)
    out_m = custom_transformer_encoder(src, spk, layer_params,
                                       final_norm_params, NHEAD,
                                       mask=causal, src_key_padding_mask=kpm)
    out_m = jax.block_until_ready(out_m)
    assert bool(jnp.all(jnp.isfinite(out_m)))
    ref_m = _reference_encoder(src, spk, layer_params, final_norm_params,
                               NHEAD, mask=causal, src_key_padding_mask=kpm)
    err_m = float(jnp.max(jnp.abs(out_m - ref_m)))
    assert err_m < 6e-2, f"masked path: max abs error vs reference: {err_m}"

    print("KERNEL_OK")
</pallas_src>

<mosaic_0001>
module attributes {stable_mosaic.version = 11 : i64} {
  func.func @qkv_proj_kernel(%arg0: i32, %arg1: i32, %arg2: memref<1x128x128xbf16, #tpu.memory_space<vmem>>, %arg3: memref<1x1x128xf32, #tpu.memory_space<vmem>>, %arg4: memref<128x128xbf16, #tpu.memory_space<vmem>>, %arg5: memref<1x128xf32, #tpu.memory_space<vmem>>, %arg6: memref<1x4x128x128xbf16, #tpu.memory_space<vmem>>, %arg7: memref<1x4x128x128xbf16, #tpu.memory_space<vmem>>, %arg8: memref<1x4x128x128xbf16, #tpu.memory_space<vmem>>) attributes {dimension_semantics = [#tpu.dimension_semantics<parallel>, #tpu.dimension_semantics<parallel>], iteration_bounds = array<i64: 2, 1>, scalar_prefetch = 0 : i64, scratch_operands = 0 : i64, tpu.core_type = #tpu.core_type<tc>, window_params = [{transform_indices = @transform_0, window_bounds = array<i64: 1, 128, 128>}, {transform_indices = @transform_1, window_bounds = array<i64: 1, 1, 128>}, {pipeline_mode = #tpu.pipeline_mode<synchronous>, transform_indices = @transform_2, window_bounds = array<i64: 128, 128>}, {pipeline_mode = #tpu.pipeline_mode<synchronous>, transform_indices = @transform_3, window_bounds = array<i64: 1, 128>}, {transform_indices = @transform_4, window_bounds = array<i64: 1, 4, 128, 128>}, {transform_indices = @transform_5, window_bounds = array<i64: 1, 4, 128, 128>}, {transform_indices = @transform_6, window_bounds = array<i64: 1, 4, 128, 128>}]} {
    %c0 = arith.constant 0 : index
    %c0_0 = arith.constant 0 : index
    %c0_1 = arith.constant 0 : index
    %0 = vector.load %arg2[%c0, %c0_0, %c0_1] : memref<1x128x128xbf16, #tpu.memory_space<vmem>>, vector<1x128x128xbf16>
    %1 = vector.shape_cast %0 : vector<1x128x128xbf16> to vector<128x128xbf16>
    %2 = arith.extf %1 : vector<128x128xbf16> to vector<128x128xf32>
    %c0_2 = arith.constant 0 : index
    %c0_3 = arith.constant 0 : index
    %c0_4 = arith.constant 0 : index
    %3 = vector.load %arg3[%c0_2, %c0_3, %c0_4] : memref<1x1x128xf32, #tpu.memory_space<vmem>>, vector<1x1x128xf32>
    %4 = vector.shape_cast %3 : vector<1x1x128xf32> to vector<1x128xf32>
    %5 = vector.broadcast %4 : vector<1x128xf32> to vector<128x128xf32>
    %6 = arith.addf %2, %5 : vector<128x128xf32>
    %7 = arith.truncf %6 : vector<128x128xf32> to vector<128x128xbf16>
    %c0_5 = arith.constant 0 : index
    %c0_6 = arith.constant 0 : index
    %8 = vector.load %arg4[%c0_5, %c0_6] : memref<128x128xbf16, #tpu.memory_space<vmem>>, vector<128x128xbf16>
    %cst = arith.constant dense<0.000000e+00> : vector<128x128xf32>
    %9 = tpu.matmul %7, %8, %cst {dimension_numbers = #tpu.dot_dimension_numbers<[1], [0], [0], [1], [0, 0, 1, 1], [], []>} : vector<128x128xbf16>, vector<128x128xbf16>, vector<128x128xf32> -> vector<128x128xf32>
    %c0_7 = arith.constant 0 : index
    %c0_8 = arith.constant 0 : index
    %10 = vector.load %arg5[%c0_7, %c0_8] : memref<1x128xf32, #tpu.memory_space<vmem>>, vector<1x128xf32>
    %11 = vector.broadcast %10 : vector<1x128xf32> to vector<128x128xf32>
    %12 = arith.addf %9, %11 : vector<128x128xf32>
    %cst_9 = arith.constant 0.000000e+00 : f32
    %13 = vector.broadcast %cst_9 : f32 to vector<128x120xf32>
    %14 = vector.extract_strided_slice %12 {offsets = [0, 0], sizes = [128, 32], strides = [1, 1]} : vector<128x128xf32> to vector<128x32xf32>
    %15 = vector.extract_strided_slice %14 {offsets = [0, 0], sizes = [128, 8], strides = [1, 1]} : vector<128x32xf32> to vector<128x8xf32>
    %16 = tpu.concatenate %15, %13 in 1 : vector<128x8xf32>, vector<128x120xf32> -> vector<128x128xf32>
    %17 = vector.extract_strided_slice %14 {offsets = [0, 8], sizes = [128, 8], strides = [1, 1]} : vector<128x32xf32> to vector<128x8xf32>
    %18 = tpu.concatenate %17, %13 in 1 : vector<128x8xf32>, vector<128x120xf32> -> vector<128x128xf32>
    %19 = vector.extract_strided_slice %14 {offsets = [0, 16], sizes = [128, 8], strides = [1, 1]} : vector<128x32xf32> to vector<128x8xf32>
    %20 = tpu.concatenate %19, %13 in 1 : vector<128x8xf32>, vector<128x120xf32> -> vector<128x128xf32>
    %21 = vector.extract_strided_slice %14 {offsets = [0, 24], sizes = [128, 8], strides = [1, 1]} : vector<128x32xf32> to vector<128x8xf32>
    %22 = tpu.concatenate %21, %13 in 1 : vector<128x8xf32>, vector<128x120xf32> -> vector<128x128xf32>
    %23 = vector.shape_cast %16 : vector<128x128xf32> to vector<1x128x128xf32>
    %24 = vector.shape_cast %18 : vector<128x128xf32> to vector<1x128x128xf32>
    %25 = vector.shape_cast %20 : vector<128x128xf32> to vector<1x128x128xf32>
    %26 = vector.shape_cast %22 : vector<128x128xf32> to vector<1x128x128xf32>
    %27 = tpu.concatenate %23, %24, %25, %26 in 0 : vector<1x128x128xf32>, vector<1x128x128xf32>, vector<1x128x128xf32>, vector<1x128x128xf32> -> vector<4x128x128xf32>
    %cst_10 = arith.constant 0.353553385 : f32
    %28 = vector.broadcast %cst_10 : f32 to vector<4x128x128xf32>
    %29 = arith.mulf %27, %28 : vector<4x128x128xf32>
    %30 = vector.extract_strided_slice %12 {offsets = [0, 32], sizes = [128, 32], strides = [1, 1]} : vector<128x128xf32> to vector<128x32xf32>
    %31 = vector.extract_strided_slice %30 {offsets = [0, 0], sizes = [128, 8], strides = [1, 1]} : vector<128x32xf32> to vector<128x8xf32>
    %32 = tpu.concatenate %31, %13 in 1 : vector<128x8xf32>, vector<128x120xf32> -> vector<128x128xf32>
    %33 = vector.extract_strided_slice %30 {offsets = [0, 8], sizes = [128, 8], strides = [1, 1]} : vector<128x32xf32> to vector<128x8xf32>
    %34 = tpu.concatenate %33, %13 in 1 : vector<128x8xf32>, vector<128x120xf32> -> vector<128x128xf32>
    %35 = vector.extract_strided_slice %30 {offsets = [0, 16], sizes = [128, 8], strides = [1, 1]} : vector<128x32xf32> to vector<128x8xf32>
    %36 = tpu.concatenate %35, %13 in 1 : vector<128x8xf32>, vector<128x120xf32> -> vector<128x128xf32>
    %37 = vector.extract_strided_slice %30 {offsets = [0, 24], sizes = [128, 8], strides = [1, 1]} : vector<128x32xf32> to vector<128x8xf32>
    %38 = tpu.concatenate %37, %13 in 1 : vector<128x8xf32>, vector<128x120xf32> -> vector<128x128xf32>
    %39 = vector.shape_cast %32 : vector<128x128xf32> to vector<1x128x128xf32>
    %40 = vector.shape_cast %34 : vector<128x128xf32> to vector<1x128x128xf32>
    %41 = vector.shape_cast %36 : vector<128x128xf32> to vector<1x128x128xf32>
    %42 = vector.shape_cast %38 : vector<128x128xf32> to vector<1x128x128xf32>
    %43 = tpu.concatenate %39, %40, %41, %42 in 0 : vector<1x128x128xf32>, vector<1x128x128xf32>, vector<1x128x128xf32>, vector<1x128x128xf32> -> vector<4x128x128xf32>
    %44 = vector.extract_strided_slice %12 {offsets = [0, 64], sizes = [128, 32], strides = [1, 1]} : vector<128x128xf32> to vector<128x32xf32>
    %45 = vector.extract_strided_slice %44 {offsets = [0, 0], sizes = [128, 8], strides = [1, 1]} : vector<128x32xf32> to vector<128x8xf32>
    %46 = tpu.concatenate %45, %13 in 1 : vector<128x8xf32>, vector<128x120xf32> -> vector<128x128xf32>
    %47 = vector.extract_strided_slice %44 {offsets = [0, 8], sizes = [128, 8], strides = [1, 1]} : vector<128x32xf32> to vector<128x8xf32>
    %48 = tpu.concatenate %47, %13 in 1 : vector<128x8xf32>, vector<128x120xf32> -> vector<128x128xf32>
    %49 = vector.extract_strided_slice %44 {offsets = [0, 16], sizes = [128, 8], strides = [1, 1]} : vector<128x32xf32> to vector<128x8xf32>
    %50 = tpu.concatenate %49, %13 in 1 : vector<128x8xf32>, vector<128x120xf32> -> vector<128x128xf32>
    %51 = vector.extract_strided_slice %44 {offsets = [0, 24], sizes = [128, 8], strides = [1, 1]} : vector<128x32xf32> to vector<128x8xf32>
    %52 = tpu.concatenate %51, %13 in 1 : vector<128x8xf32>, vector<128x120xf32> -> vector<128x128xf32>
    %53 = vector.shape_cast %46 : vector<128x128xf32> to vector<1x128x128xf32>
    %54 = vector.shape_cast %48 : vector<128x128xf32> to vector<1x128x128xf32>
    %55 = vector.shape_cast %50 : vector<128x128xf32> to vector<1x128x128xf32>
    %56 = vector.shape_cast %52 : vector<128x128xf32> to vector<1x128x128xf32>
    %57 = tpu.concatenate %53, %54, %55, %56 in 0 : vector<1x128x128xf32>, vector<1x128x128xf32>, vector<1x128x128xf32>, vector<1x128x128xf32> -> vector<4x128x128xf32>
    %58 = vector.shape_cast %29 : vector<4x128x128xf32> to vector<1x4x128x128xf32>
    %59 = arith.truncf %58 : vector<1x4x128x128xf32> to vector<1x4x128x128xbf16>
    %c0_11 = arith.constant 0 : index
    %c0_12 = arith.constant 0 : index
    %c0_13 = arith.constant 0 : index
    %c0_14 = arith.constant 0 : index
    %60 = vector.load %arg6[%c0_11, %c0_12, %c0_13, %c0_14] : memref<1x4x128x128xbf16, #tpu.memory_space<vmem>>, vector<1x4x128x128xbf16>
    tpu.vector_store %arg6[%c0_11, %c0_12, %c0_13, %c0_14], %59 {strides = array<i32>} : memref<1x4x128x128xbf16, #tpu.memory_space<vmem>>, vector<1x4x128x128xbf16>,
    %61 = vector.shape_cast %43 : vector<4x128x128xf32> to vector<1x4x128x128xf32>
    %62 = arith.truncf %61 : vector<1x4x128x128xf32> to vector<1x4x128x128xbf16>
    %c0_15 = arith.constant 0 : index
    %c0_16 = arith.constant 0 : index
    %c0_17 = arith.constant 0 : index
    %c0_18 = arith.constant 0 : index
    %63 = vector.load %arg7[%c0_15, %c0_16, %c0_17, %c0_18] : memref<1x4x128x128xbf16, #tpu.memory_space<vmem>>, vector<1x4x128x128xbf16>
    tpu.vector_store %arg7[%c0_15, %c0_16, %c0_17, %c0_18], %62 {strides = array<i32>} : memref<1x4x128x128xbf16, #tpu.memory_space<vmem>>, vector<1x4x128x128xbf16>,
    %64 = vector.shape_cast %57 : vector<4x128x128xf32> to vector<1x4x128x128xf32>
    %65 = arith.truncf %64 : vector<1x4x128x128xf32> to vector<1x4x128x128xbf16>
    %c0_19 = arith.constant 0 : index
    %c0_20 = arith.constant 0 : index
    %c0_21 = arith.constant 0 : index
    %c0_22 = arith.constant 0 : index
    %66 = vector.load %arg8[%c0_19, %c0_20, %c0_21, %c0_22] : memref<1x4x128x128xbf16, #tpu.memory_space<vmem>>, vector<1x4x128x128xbf16>
    tpu.vector_store %arg8[%c0_19, %c0_20, %c0_21, %c0_22], %65 {strides = array<i32>} : memref<1x4x128x128xbf16, #tpu.memory_space<vmem>>, vector<1x4x128x128xbf16>,
    return
  }
  func.func @transform_0(%arg0: i32, %arg1: i32) -> (i32, i32, i32) {
    %c0_i32 = arith.constant 0 : i32
    %c0_i32_0 = arith.constant 0 : i32
    return %arg0, %arg1, %c0_i32 : i32, i32, i32
  }
  func.func @transform_1(%arg0: i32, %arg1: i32) -> (i32, i32, i32) {
    %c0_i32 = arith.constant 0 : i32
    %c0_i32_0 = arith.constant 0 : i32
    %c0_i32_1 = arith.constant 0 : i32
    return %arg0, %c0_i32, %c0_i32_0 : i32, i32, i32
  }
  func.func @transform_2(%arg0: i32, %arg1: i32) -> (i32, i32) {
    %c0_i32 = arith.constant 0 : i32
    %c0_i32_0 = arith.constant 0 : i32
    %c0_i32_1 = arith.constant 0 : i32
    return %c0_i32, %c0_i32_0 : i32, i32
  }
  func.func @transform_3(%arg0: i32, %arg1: i32) -> (i32, i32) {
    %c0_i32 = arith.constant 0 : i32
    %c0_i32_0 = arith.constant 0 : i32
    %c0_i32_1 = arith.constant 0 : i32
    return %c0_i32, %c0_i32_0 : i32, i32
  }
  func.func @transform_4(%arg0: i32, %arg1: i32) -> (i32, i32, i32, i32) {
    %c0_i32 = arith.constant 0 : i32
    %c0_i32_0 = arith.constant 0 : i32
    %c0_i32_1 = arith.constant 0 : i32
    return %arg0, %c0_i32, %arg1, %c0_i32_0 : i32, i32, i32, i32
  }
  func.func @transform_5(%arg0: i32, %arg1: i32) -> (i32, i32, i32, i32) {
    %c0_i32 = arith.constant 0 : i32
    %c0_i32_0 = arith.constant 0 : i32
    %c0_i32_1 = arith.constant 0 : i32
    return %arg0, %c0_i32, %arg1, %c0_i32_0 : i32, i32, i32, i32
  }
  func.func @transform_6(%arg0: i32, %arg1: i32) -> (i32, i32, i32, i32) {
    %c0_i32 = arith.constant 0 : i32
    %c0_i32_0 = arith.constant 0 : i32
    %c0_i32_1 = arith.constant 0 : i32
    return %arg0, %c0_i32, %arg1, %c0_i32_0 : i32, i32, i32, i32
  }
}

</mosaic_0001>

<bundles_post_ra>
// kernel: tpu_custom_call.1
= control target key start
LH: loop header
LB: loop body
LE: loop exit
PB: predicated region body
PF: predicated region fallthrough
CT: control target
= control target key end

     0   :  { %s5536_s0 = inlined_call_operand.hbm [shape: bf16[2,128,128], index: 0, kind: input, shape index: {}]   ;;  %s5537_s1 = inlined_call_operand.hbm [shape: f32[2,1,128], index: 1, kind: input, shape index: {}]   ;;  %s5538_s2 = inlined_call_operand.hbm [shape: bf16[128,128], index: 2, kind: input, shape index: {}]   ;;  %s5539_s3 = inlined_call_operand.hbm [shape: f32[1,128], index: 3, kind: input, shape index: {}]   ;;  %s5540_s4 = inlined_call_operand.hbm [shape: bf16[2,4,128,128], index: 4, kind: output, shape index: {0}]   ;;  %s5541_s5 = inlined_call_operand.hbm [shape: bf16[2,4,128,128], index: 5, kind: output, shape index: {1}]   ;;  %s5542_s6 = inlined_call_operand.hbm [shape: bf16[2,4,128,128], index: 6, kind: output, shape index: {2}]  }
   0x1   :  { %5551 = sst [smem:[#allocation22_spill]] %s5536_s0 }
   0x2   :  { %5552 = sst [smem:[#allocation23_spill]] %s5538_s2 }
   0x3   :  { %5553 = sst [smem:[#allocation24_spill]] %s5539_s3 }
   0x4   :  { %12 = vsyncpa [#allocation3], 0 }
   0x5   :  { %14 = vsyncpa [#allocation3 + $0x1], 0 }
   0x6   :  { %15 = vsyncpa [#allocation6], 0 }
   0x7   :  { %17 = vsyncpa [#allocation6 + $0x1], 0 }
   0x8   :  { %18 = vsyncpa [#allocation9], 0 }
   0x9   :  { %19 = vsyncpa [#allocation4], 0 }
   0xa   :  { %21 = vsyncpa [#allocation4 + $0x1], 0 }
   0xb   :  { %22 = vsyncpa [#allocation12], 0 }
   0xc   :  { %24 = vsyncpa [#allocation12 + $0x1], 0  ;;  %s4493_s21 = smov 0   ;;  %s4495_s22 = smov 0  }
   0xd   :  { %s4497_s23 = smov 0   ;;  %s4499_s24 = smov 0  }
   0xe   :  { %s4501_s25 = smov 0   ;;  %s4503_s26 = smov 0  }
   0xf LB: > { %s4524_s27 = sadd.s32 4294967295, %s4435_s26   ;;  %s5544_s28 = sadd.s32 4294967294, %s4435_s26   ;;  %s4435_s26 = sphi %s4503_s26, %s30_s26   ;;  %s4431_s25 = sphi %s4501_s25, %s5585_s25   ;;  %s4427_s24 = sphi %s4499_s24, %s5584_s24   ;;  %s4423_s23 = sphi %s4497_s23, %s5583_s23   ;;  %s4419_s22 = sphi %s4495_s22, %s5582_s22   ;;  %s4415_s21 = sphi %s4493_s21, %s5581_s21  }
  0x10   : > { %p64_p0 = scmp.ne.s32.totalorder %s4419_s22, %s4415_s21  ;;  %p5543_p1 = scmp.eq.s32.totalorder %s4524_s27, 0 }
  0x11   : > { %p164_p3 = scmp.eq.s32.totalorder %s5544_s28, 1  ;;  %p2625_p5 = scmp.ge.s32.totalorder %s4435_s26, 1 }
  0x12   : > { %p4535_p4 = por %p5543_p1, %p64_p0  ;;  %p227_p7 = scmp.lt.s32.totalorder %s4435_s26, 3 }
  0x13   : > { %p4540_p6 = por %p164_p3, %p64_p0  ;;  %s4437_s8 = smov [#allocation7]  }
  0x14   : > { %s5554_s29 = scalar_select %p4535_p4, 1, 0 }
  0x15   : > { %s5555_s30 = scalar_select %p4540_p6, 1, 0 }
  0x16   : > { %p4545_p8 = pnand %p2625_p5, %p227_p7  ;;  %s239_s9 = sshll.u32 %s4437_s8, 4  ;;  %s4549_s9 = int_to_ptr.vmem [resolvable:$true] %s239_s9 }
  0x17   : > { %s4438_s11 = smov [#allocation8]   ;;  %s5558_s2 = sld [smem:[#allocation23_spill]] }
  0x18   : > { %s5556_s7 = scalar_select %p4545_p8, 1, 0 }
  0x19   : > { %p3743_p9 = pneg %p4545_p8  ;;  %s253_s12 = sshll.u32 %s4438_s11, 4  ;;  %s4560_s12 = int_to_ptr.vmem [resolvable:$true] %s253_s12 }
  0x1b   : > { %p4556_p11 = pnand %p3743_p9, %p5543_p1 }
  0x1d   : > { %s4165_s15 = scalar_lea.hbm %s5558_s2, 1024  ;;  %p4167_p13 = pneg %p4556_p11 }
  0x1e   : > { %p4166_p12 = scmp.ne.s32.totalorder %s5558_s2, %s4165_s15  ;;  %p4172_p5 = scmp.lt.u32.totalorder %s4165_s15, %s5558_s2 }
  0x20   : > { %p4168_p0 = pnand %p4167_p13, %p4166_p12 }
  0x22   : > { %p4169_p3 = pneg %p4168_p0 }
  0x24   : > { %p4174_p7 = pnand %p4172_p5, %p4169_p3 }
  0x26   : > { %4177 = shalt.err (!%p4174_p7)
}
  0x27   : > { %s4178_s20 = scalar_lea.vmem %s4549_s9, 1024  ;;  %p4186_p2 = scmp.lt.s32.totalorder %s4549_s9, %s4549_s9 }
  0x28   : > { %p4179_p9 = scmp.ne.s32.totalorder %s4549_s9, %s4178_s20  ;;  %p4187_p12 = scmp.lt.s32.totalorder %s4178_s20, %s4178_s20 }
  0x2a   : > { %p4181_p10 = pnand %p4179_p9, %p4167_p13  ;;  %p4188_p0 = por %p4187_p12, %p4186_p2 }
  0x2c   : > { %p4182_p1 = pneg %p4181_p10 }
  0x2e   : > { %p4189_p6 = pnand %p4188_p0, %p4182_p1 }
  0x30   : > { %4192 = shalt.err (!%p4189_p6)
}
  0x31   : > { %s5545_s8 = smov 64   ;;  %s5546_s11 = smov 4  }
  0x32   : > { %3746 = dma.hbm_to_vmem [thread:$0]  (!%p4556_p11), %s5558_s2, 1024, %s4549_s9, [#allocation6], %s5545_s8, %s5545_s8, %s5546_s11  }
  0x33   : > { %s5559_s3 = sld [smem:[#allocation24_spill]] }
  0x39   : > { %s4193_s17 = scalar_lea.hbm %s5559_s3, 16 }
  0x3a   : > { %p4194_p1 = scmp.ne.s32.totalorder %s5559_s3, %s4193_s17  ;;  %p4200_p10 = scmp.lt.u32.totalorder %s4193_s17, %s5559_s3 }
  0x3c   : > { %p4196_p2 = pnand %p4194_p1, %p4167_p13 }
  0x3e   : > { %p4197_p6 = pneg %p4196_p2 }
  0x40   : > { %p4202_p3 = pnand %p4200_p10, %p4197_p6 }
  0x42   : > { %4205 = shalt.err (!%p4202_p3)
}
  0x43   : > { %s4206_s9 = scalar_lea.vmem %s4560_s12, 16  ;;  %s4213_s13 = scalar_lea.vmem %s4560_s12, 32 }
  0x44   : > { %p4207_p5 = scmp.ne.s32.totalorder %s4560_s12, %s4206_s9  ;;  %p4214_p12 = scmp.lt.s32.totalorder %s4560_s12, %s4560_s12 }
  0x45   : > { %p4215_p0 = scmp.lt.s32.totalorder %s4213_s13, %s4206_s9 }
  0x46   : > { %p4209_p7 = pnand %p4207_p5, %p4167_p13 }
  0x47   : > { %p4216_p1 = por %p4215_p0, %p4214_p12 }
  0x48   : > { %p4210_p9 = pneg %p4209_p7 }
  0x4a   : > { %p4217_p2 = pnand %p4216_p1, %p4210_p9 }
  0x4c   : > { %4220 = shalt.err (!%p4217_p2)
}
  0x4d   : > { %3749 = dma.hbm_to_vmem [thread:$0]  (!%p4556_p11), %s5559_s3, 16, %s4560_s12, [#allocation9]  }
  0x4e   : > { %s42_s15 = sadd.s32 1, %s4431_s25  ;;  %s51_s16 = sadd.s32 1, %s4423_s23 }
  0x4f   : > { %p44_p13 = scmp.ge.s32.totalorder %s42_s15, 2  ;;  %p58_p6 = scmp.ne.s32.totalorder %s4423_s23, %s4419_s22 }
  0x50   : > { %p59_p10 = scmp.eq.s32.totalorder %s4435_s26, 0  ;;  %p3769_p3 = scmp.lt.s32.totalorder %s4435_s26, 2 }
  0x51   : > { %s5587_s15 = smov (%p44_p13, %s42_s15), 0  ;;  %p5561_p7 = scmp.eq.s32.totalorder %s4524_s27, 1 }
  0x52   : > { %5560 = sst [smem:[#allocation20_spill]] %s5587_s15  ;;  %p60_p5 = por %p59_p10, %p58_p6 }
  0x53   : > { %p4628_p9 = por %p5561_p7, %p58_p6  ;;  %s46_s17 = ssub.s32 %s4431_s25, %s5587_s15 }
  0x54   : > { %s4635_s18 = sand.u32 1, %s4423_s23   ;;  %p49_p11 = scmp.eq.s32.totalorder %s46_s17, 0 }
  0x55   : > { %s5562_s10 = scalar_select %p4628_p9, 1, 0 }
  0x56   : > { %s2629_s12 = sshll.u32 %s4635_s18, 6  ;;  %s2853_s19 = sshll.u32 %s4431_s25, 10 }
  0x57   : > { %s4640_s20 = scalar_select %p49_p11, %s4423_s23, %s51_s16  }
  0x58   : > { %s5564_s0 = sld [smem:[#allocation22_spill]]  ;;  %s268_s14 = scalar_lea.vmem [#allocation2], %s2629_s12 }
  0x59   : > { %5563 = sst [smem:[#allocation21_spill]] %s4640_s20  ;;  %s277_s8 = sshll.u32 %s268_s14, 4  ;;  %s4653_s8 = int_to_ptr.vmem [resolvable:$true] %s277_s8 }
  0x5a   : > { %p4649_p12 = pnand %p3769_p3, %p60_p5  ;;  %s265_s17 = scalar_lea.sflag [#allocation3], %s4635_s18 }
  0x5c   : > { %p4223_p1 = pneg %p4649_p12 }
  0x5e   : > { %s4645_s28 = scalar_lea.hbm %s5564_s0, %s2853_s19  ;;  %s4226_s13 = scalar_lea.hbm %s5564_s0, 2048 }
  0x5f   : > { %s4221_s9 = scalar_lea.hbm %s4645_s28, 1024  ;;  %p4227_p6 = scmp.lt.u32.totalorder %s4645_s28, %s5564_s0 }
  0x60   : > { %p4222_p0 = scmp.ne.s32.totalorder %s4645_s28, %s4221_s9  ;;  %p4228_p10 = scmp.lt.u32.totalorder %s4226_s13, %s4221_s9 }
  0x61   : > { %p4230_p5 = scmp.lt.u32.totalorder %s4221_s9, %s4645_s28 }
  0x62   : > { %p4224_p2 = pnand %p4223_p1, %p4222_p0  ;;  %p4229_p3 = por %p4228_p10, %p4227_p6 }
  0x64   : > { %p4225_p13 = pneg %p4224_p2  ;;  %p4231_p7 = por %p4230_p5, %p4229_p3 }
  0x66   : > { %p4232_p11 = pnand %p4231_p7, %p4225_p13 }
  0x68   : > { %4235 = shalt.err (!%p4232_p11)
}
  0x69   : > { %s4236_s16 = scalar_lea.vmem %s4653_s8, 1024  ;;  %s4441_s12 = smov [#allocation2]  }
  0x6a   : > { %p4237_p0 = scmp.ne.s32.totalorder %s4653_s8, %s4236_s16  ;;  %s4241_s19 = sshll.u32 %s4441_s12, 4  ;;  %s4242_s19 = int_to_ptr.vmem [resolvable:$false] %s4241_s19 }
  0x6b   : > { %s4243_s2 = scalar_lea.vmem %s4242_s19, 2048  ;;  %p4244_p4 = scmp.lt.s32.totalorder %s4653_s8, %s4242_s19 }
  0x6c   : > { %p4239_p2 = pnand %p4237_p0, %p4223_p1  ;;  %p4245_p6 = scmp.lt.s32.totalorder %s4243_s2, %s4236_s16 }
  0x6e   : > { %p4240_p9 = pneg %p4239_p2  ;;  %p4246_p10 = por %p4245_p6, %p4244_p4 }
  0x70   : > { %p4247_p3 = pnand %p4246_p10, %p4240_p9 }
  0x72   : > { %4250 = shalt.err (!%p4247_p3)
}
  0x73   : > { %s5566_s9 = smov 4   ;;  %s5567_s13 = smov 64  }
  0x74   : > { %3753 = dma.hbm_to_vmem [thread:$0]  (!%p4649_p12), %s4645_s28, 1024, %s4653_s8, %s265_s17, %s5567_s13, %s5567_s13, %s5566_s9  }
  0x75   : > { %s2632_s14 = sshll.u32 %s4431_s25, 4  ;;  %s290_s2 = scalar_lea.vmem [#allocation5], %s4635_s18 }
  0x76   : > { %s4691_s19 = scalar_lea.hbm %s5537_s1, %s2632_s14  ;;  %s297_s0 = sshll.u32 %s290_s2, 4  ;;  %s298_s0 = int_to_ptr.vmem [resolvable:$true] %s297_s0 }
  0x77   : > { %s5568_s3 = sand.u32 1, %s4435_s26   ;;  %s4251_s20 = scalar_lea.hbm %s4691_s19, 16 }
  0x78   : > { %s288_s15 = scalar_lea.sflag [#allocation6], %s5568_s3  ;;  %p4252_p4 = scmp.ne.s32.totalorder %s4691_s19, %s4251_s20 }
  0x79   : > { %s4256_s17 = scalar_lea.hbm %s5537_s1, 32  ;;  %p4257_p5 = scmp.lt.u32.totalorder %s4691_s19, %s5537_s1 }
  0x7a   : > { %p4254_p9 = pnand %p4252_p4, %p4223_p1  ;;  %p4258_p7 = scmp.lt.u32.totalorder %s4256_s17, %s4251_s20 }
  0x7b   : > { %p4260_p0 = scmp.lt.u32.totalorder %s4251_s20, %s4691_s19 }
  0x7c   : > { %p4255_p13 = pneg %p4254_p9  ;;  %p4259_p11 = por %p4258_p7, %p4257_p5 }
  0x7e   : > { %p4261_p2 = por %p4260_p0, %p4259_p11 }
  0x80   : > { %p4262_p6 = pnand %p4261_p2, %p4255_p13 }
  0x82   : > { %4265 = shalt.err (!%p4262_p6)
}
  0x83   : > { %s4266_s3 = scalar_lea.vmem %s298_s0, 16  ;;  %s4442_s18 = smov [#allocation5]  }
  0x84   : > { %p4267_p10 = scmp.ne.s32.totalorder %s298_s0, %s4266_s3  ;;  %s4271_s14 = sshll.u32 %s4442_s18, 4  ;;  %s4272_s14 = int_to_ptr.vmem [resolvable:$false] %s4271_s14 }
  0x85   : > { %s4273_s12 = scalar_lea.vmem %s4272_s14, 32  ;;  %p4274_p9 = scmp.lt.s32.totalorder %s298_s0, %s4272_s14 }
  0x86   : > { %p4269_p3 = pnand %p4267_p10, %p4223_p1  ;;  %p4275_p8 = scmp.lt.s32.totalorder %s4273_s12, %s4266_s3 }
  0x88   : > { %p4270_p4 = pneg %p4269_p3  ;;  %p4276_p5 = por %p4275_p8, %p4274_p9 }
  0x8a   : > { %p4277_p7 = pnand %p4276_p5, %p4270_p4 }
  0x8c   : > { %4280 = shalt.err (!%p4277_p7)
}
  0x8d   : > { %3756 = dma.hbm_to_vmem [thread:$0]  (!%p4649_p12), %s4691_s19, 16, %s298_s0, %s288_s15  }
  0x8e   : > { %p5569_p13 = scmp.ne.s32.totalorder %s5556_s7, 0 }
  0x8f   : > { %s4718_s20 = sand.u32 (!%p5569_p13), 1, %s4419_s22   ;;  %p5570_p8 = scmp.ne.s32.totalorder (!%p5569_p13), %s5554_s29, 0 }
  0x90   : > { %306 = sbr.rel (%p5569_p13) target bundleno = 795 (0x31b), region = 36  ;;  %s2634_s16 = sshll.u32 (!%p5569_p13), %s4718_s20, 6 }
  0x91   : > { %s309_s2 = scalar_lea.sflag (!%p5569_p13), [#allocation3], %s4718_s20  ;;  %s4722_s8 = scalar_lea.vmem (!%p5569_p13), [#allocation2], %s2634_s16 }
  0x97   : > { %4390 = dma.done.wait (%p5570_p8), %s309_s2, 1024  }
  0x98   : > { %4392 = vsyncadd (%p5570_p8), %s309_s2, 4294966272  ;;  %s317_s0 = sand.u32 1, %s4524_s27   ;;  %s320_s11 = scalar_lea.vmem [#allocation5], %s4718_s20 }
  0x99   : > { %s318_s7 = scalar_lea.sflag [#allocation6], %s317_s0 }
  0x9a   : > { %4394 = dma.done.wait (%p5570_p8), %s318_s7, 16  }
  0x9b   : > { %4396 = vsyncadd (%p5570_p8), %s318_s7, 4294967280  ;;  %p5571_p12 = scmp.eq.s32.totalorder %s4524_s27, 0 }
  0x9d   : > { %4398 = dma.done.wait (%p5571_p12), [#allocation6], 1024   ;;  %p5572_p1 = pmov %p5571_p12 }
  0x9f   : > { %4400 = vsyncadd (%p5572_p1), [#allocation6], 4294966272  ;;  %p5573_p11 = pmov %p5572_p1 }
  0xa0   : > { %p5574_p0 = pmov %p5572_p1 }
  0xa1   : > { %4402 = dma.done.wait (%p5573_p11), [#allocation9], 16  }
  0xa2   : > { %4404 = vsyncadd (%p5574_p0), [#allocation9], 4294967280  ;;  %v4157_v0 = vld [vmem:[#allocation7] sm:$0xff]   ;;  %v4158_v1 = vld [vmem:[#allocation7 + $0x8] sm:$0xff]   ;;  %vm607_vm0 = vcmask 64512   ;;  %s4443_s29 = smov 120  }
  0xa3   : > { %3677 = vmatprep.subr.bf16.mxu0 %v4157_v0  ;;  %3709 = vmatprep.subr.bf16.mxu1 %v4157_v0  ;;  %v4159_v2 = vld [vmem:[#allocation7 + $0x10] sm:$0xff]   ;;  %v4160_v3 = vld [vmem:[#allocation7 + $0x18] sm:$0xff]   ;;  %v4161_v14 = vld [vmem:[#allocation7 + $0x20] sm:$0xff]   ;;  %s4799_s15 = sshll.u32 %s4718_s20, 8  ;;  %s4444_s19 = smov 112  }
  0xa4   : > { %3678 = vmatpush3.bf16.msra.mxu0 %v4157_v0  ;;  %3717 = vmatpush3.bf16.msra.mxu1 %v4157_v0  ;;  %v3050_v4 = vld [vmem:[%s4722_s8] sm:$0xff]   ;;  %v4162_v18 = vld [vmem:[#allocation7 + $0x28] sm:$0xff]   ;;  %v4163_v22 = vld [vmem:[#allocation7 + $0x30] sm:$0xff]   ;;  %s4826_s28 = scalar_lea.vmem [#allocation10], %s4799_s15  ;;  %s4445_s17 = smov 104  }
  0xa5   : > { %3679 = vmatprep.subr.bf16.mxu0 %v4158_v1  ;;  %3710 = vmatprep.subr.bf16.mxu1 %v4158_v1  ;;  %v4745_v5 = vld [vmem:[%s320_s11] ss:$0 sm:$0xff]  ;;  %v3051_v7 = vunpack.c.l.bf16 %v3050_v4  ;;  %v3052_v8 = vunpack.c.h.bf16 %v3050_v4  ;;  %v3561_v19 = vld [vmem:[%s4722_s8 + $0x8] sm:$0xff]   ;;  %v3562_v21 = vld [vmem:[%s4722_s8 + $0x10] sm:$0xff]   ;;  %s4446_s9 = smov 96   ;;  %s4447_s13 = smov 88  }
  0xa6   : > { %v3564_v6 = vld [vmem:[%s4722_s8 + $0x20] sm:$0xff]   ;;  %v3565_v20 = vld [vmem:[%s4722_s8 + $0x28] sm:$0xff]   ;;  %v3566_v23 = vld [vmem:[%s4722_s8 + $0x30] sm:$0xff]   ;;  %v3055_v24 = vunpack.c.l.bf16 %v3561_v19  ;;  %v3056_v25 = vunpack.c.h.bf16 %v3561_v19  ;;  %v3059_v28 = vunpack.c.l.bf16 %v3562_v21  ;;  %v3060_v29 = vunpack.c.h.bf16 %v3562_v21  ;;  %s4448_s3 = smov 80   ;;  %s4449_s18 = smov 72  }
  0xa7   : > { %v3067_v9 = vunpack.c.l.bf16 %v3564_v6  ;;  %v3068_v10 = vunpack.c.h.bf16 %v3564_v6  ;;  %v415_v11 = vadd.f32 %v3051_v7, %v4745_v5  ;;  %v416_v12 = vadd.f32 %v3052_v8, %v4745_v5  ;;  %v4164_v32 = vld [vmem:[#allocation7 + $0x38] sm:$0xff]   ;;  %v4770_v57 = vld [vmem:[#allocation8] ss:$0 sm:$0xff]  ;;  %s4450_s14 = smov 64   ;;  %s4451_s12 = smov 56  }
  0xa8   : > { %3680 = vmatpush3.bf16.msra.mxu0 %v4158_v1  ;;  %3718 = vmatpush3.bf16.msra.mxu1 %v4158_v1  ;;  %v3071_v26 = vunpack.c.l.bf16 %v3565_v20  ;;  %v3072_v27 = vunpack.c.h.bf16 %v3565_v20  ;;  %v3075_v30 = vunpack.c.l.bf16 %v3566_v23  ;;  %v3076_v31 = vunpack.c.h.bf16 %v3566_v23  ;;  %v3563_v38 = vld [vmem:[%s4722_s8 + $0x18] sm:$0xff]   ;;  %s4452_s16 = smov 48   ;;  %s4453_s2 = smov 40  }
  0xa9   : > { %3681 = vmatprep.subr.bf16.mxu0 %v4159_v2  ;;  %3711 = vmatprep.subr.bf16.mxu1 %v4159_v2  ;;  %v423_v13 = vadd.f32 %v3067_v9, %v4745_v5  ;;  %v424_v15 = vadd.f32 %v3068_v10, %v4745_v5  ;;  %v431_v16 = vpack.c.bf16 %v416_v12, %v415_v11  ;;  %v3567_v42 = vld [vmem:[%s4722_s8 + $0x38] sm:$0xff]   ;;  %v3063_v44 = vunpack.c.l.bf16 %v3563_v38  ;;  %s5038_s8 = scalar_lea.vmem [#allocation11], %s4799_s15  ;;  %s5123_s7 = scalar_lea.vmem [#allocation13], %s4799_s15 }
  0xaa   : > { %v417_v33 = vadd.f32 %v3055_v24, %v4745_v5  ;;  %v418_v34 = vadd.f32 %v3056_v25, %v4745_v5  ;;  %v425_v35 = vadd.f32 %v3071_v26, %v4745_v5  ;;  %v426_v36 = vadd.f32 %v3072_v27, %v4745_v5  ;;  %s5337_s11 = sshll.u32 %s4427_s24, 12  ;;  %p5575_p6 = scmp.ne.s32.totalorder %s5562_s10, 0 }
  0xab   : > { %v435_v17 = vpack.c.bf16 %v424_v15, %v423_v13  ;;  %3693 = vmatprep.mubr.bf16.mxu0 %v431_v16  ;;  %v419_v37 = vadd.f32 %v3059_v28, %v4745_v5  ;;  %v420_v39 = vadd.f32 %v3060_v29, %v4745_v5  ;;  %v427_v40 = vadd.f32 %v3075_v30, %v4745_v5 }
  0xac   : > { %3682 = vmatpush3.bf16.msra.mxu0 %v4159_v2  ;;  %3719 = vmatpush3.bf16.msra.mxu1 %v4159_v2  ;;  %v428_v41 = vadd.f32 %v3076_v31, %v4745_v5  ;;  %v432_v43 = vpack.c.bf16 %v418_v34, %v417_v33  ;;  %v436_v45 = vpack.c.bf16 %v426_v36, %v425_v35  ;;  %v3064_v46 = vunpack.c.h.bf16 %v3563_v38 }
  0xad   : > { %3683 = vmatprep.subr.bf16.mxu0 %v4160_v3  ;;  %3712 = vmatprep.subr.bf16.mxu1 %v4160_v3  ;;  %v3079_v47 = vunpack.c.l.bf16 %v3567_v42  ;;  %v3080_v48 = vunpack.c.h.bf16 %v3567_v42  ;;  %v433_v49 = vpack.c.bf16 %v420_v39, %v419_v37  ;;  %v421_v51 = vadd.f32 %v3063_v44, %v4745_v5 }
  0xae   : > { %3701 = vmatprep.mubr.bf16.mxu1 %v435_v17  ;;  %v437_v50 = vpack.c.bf16 %v428_v41, %v427_v40  ;;  %v422_v52 = vadd.f32 %v3064_v46, %v4745_v5 }
  0xaf   : > { %v429_v53 = vadd.f32 %v3079_v47, %v4745_v5  ;;  %v430_v54 = vadd.f32 %v3080_v48, %v4745_v5 }
  0xb0   : > { %3684 = vmatpush3.bf16.msra.mxu0 %v4160_v3  ;;  %3720 = vmatpush3.bf16.msra.mxu1 %v4160_v3  ;;  %v434_v55 = vpack.c.bf16 %v422_v52, %v421_v51 }
  0xb1   : > { %3685 = vmatprep.subr.bf16.mxu0 %v4161_v14  ;;  %3713 = vmatprep.subr.bf16.mxu1 %v4161_v14  ;;  %v438_v56 = vpack.c.bf16 %v430_v54, %v429_v53 }
  0xb4   : > { %3686 = vmatpush3.bf16.msra.mxu0 %v4161_v14  ;;  %3721 = vmatpush3.bf16.msra.mxu1 %v4161_v14 }
  0xb5   : > { %3687 = vmatprep.subr.bf16.mxu0 %v4162_v18  ;;  %3714 = vmatprep.subr.bf16.mxu1 %v4162_v18 }
  0xb8   : > { %3688 = vmatpush3.bf16.msra.mxu0 %v4162_v18  ;;  %3722 = vmatpush3.bf16.msra.mxu1 %v4162_v18 }
  0xb9   : > { %3689 = vmatprep.subr.bf16.mxu0 %v4163_v22  ;;  %3715 = vmatprep.subr.bf16.mxu1 %v4163_v22 }
  0xbc   : > { %3690 = vmatpush3.bf16.msra.mxu0 %v4163_v22  ;;  %3723 = vmatpush3.bf16.msra.mxu1 %v4163_v22 }
  0xbd   : > { %3691 = vmatprep.subr.bf16.mxu0 %v4164_v32  ;;  %3716 = vmatprep.subr.bf16.mxu1 %v4164_v32 }
  0xc0   : > { %3692 = vmatpush3.bf16.msra.mxu0 %v4164_v32  ;;  %3724 = vmatpush3.bf16.msra.mxu1 %v4164_v32 }
  0xc3   : > { %3694 = vmatmul.mubr.bf16.vlgmr.msra.gmra.mrb[0].mxu0 %v432_v43  ;;  %3702 = vmatmul.mubr.bf16.vlgmr.msra.gmra.mrb[0].mxu1 %v436_v45 }
  0xc4   : > { %3697 = vmatprep.mubr.bf16.mxu0 %v433_v49  ;;  %3705 = vmatprep.mubr.bf16.mxu1 %v437_v50 }
  0xcb   : > { %3698 = vmatmul.mubr.bf16.gmra.mrb[4].mxu0 %v434_v55  ;;  %3706 = vmatmul.mubr.bf16.gmra.mrb[4].mxu1 %v438_v56 }
 0x196   : > { %v3695_v58 = vpop.f32.mrb[0].mxu0  ;;  %v3703_v59 = vpop.f32.mrb[0].mxu1 }
 0x197   : > { %v553_v60 = vadd.f32 %v3695_v58, %v4770_v57  ;;  %v4774_v61 = vadd.f32 %v3703_v59, %v4770_v57  ;;  %v544_v62 = vpop.f32.mrb[1].mxu0  ;;  %v576_v63 = vpop.f32.mrb[1].mxu1 }
 0x198   : > { %v4777_v0 = vadd.f32 %v4770_v57, %v544_v62  ;;  %v4780_v1 = vadd.f32 %v4770_v57, %v576_v63  ;;  %v3696_v2 = vpop.f32.mrb[2].mxu0  ;;  %v3704_v3 = vpop.f32.mrb[2].mxu1 }
 0x199   : > { %v610_v4 = vsel %vm607_vm0, %v553_v60, 0.0  ;;  %v618_v5 = vsel %vm607_vm0, %v4774_v61, 0.0  ;;  %v4786_v6 = vadd.f32 %v3696_v2, %v4770_v57  ;;  %v4789_v7 = vadd.f32 %v3704_v3, %v4770_v57  ;;  %660 = vrot.lane.b32.xlu0 %v4774_v61, %s4443_s29  ;;  %v579_v8 = vpop.f32.mrb[3].mxu1  ;;  %644 = vrot.lane.b32.xlu1 %v553_v60, %s4443_s29  ;;  %v547_v9 = vpop.f32.mrb[3].mxu0 }
 0x19a   : > { %v834_v10 = vmul.f32 0.35355338, %v610_v4  ;;  %v608_v11 = vsel %vm607_vm0, %v4777_v0, 0.0  ;;  %v616_v12 = vsel %vm607_vm0, %v4780_v1, 0.0  ;;  %v842_v13 = vmul.f32 0.35355338, %v618_v5 }
 0x19b   : > { %v832_v14 = vmul.f32 0.35355338, %v608_v11  ;;  %v611_v15 = vsel %vm607_vm0, %v4786_v6, 0.0  ;;  %v619_v16 = vsel %vm607_vm0, %v4789_v7, 0.0  ;;  %v4806_v19 = vadd.f32 %v4770_v57, %v579_v8 }
 0x19c   : > { %v835_v17 = vmul.f32 0.35355338, %v611_v15  ;;  %v843_v18 = vmul.f32 0.35355338, %v619_v16  ;;  %v4809_v20 = vadd.f32 %v4770_v57, %v547_v9  ;;  %v840_v21 = vmul.f32 0.35355338, %v616_v12 }
 0x19d   : > { %708 = vrot.lane.b32.xlu0 %v553_v60, %s4444_s19  ;;  %646 = vrot.lane.b32.xlu1 %v4786_v6, %s4443_s29  ;;  %v4815_v22 = vpack.i.bf16 %v4786_v6, %v553_v60  ;;  %v4819_v23 = vpack.i.bf16 %v4789_v7, %v4774_v61  ;;  %v617_v26 = vsel %vm607_vm0, %v4806_v19, 0.0 }
 0x19e   : > { %v3089_v24 = vpack.c.bf16 %v835_v17, %v834_v10  ;;  %v3109_v25 = vpack.c.bf16 %v843_v18, %v842_v13  ;;  %v609_v27 = vsel %vm607_vm0, %v4809_v20, 0.0  ;;  %v3699_v28 = vpop.f32.mrb[4].mxu0  ;;  %v3707_v29 = vpop.f32.mrb[4].mxu1  ;;  %v841_v30 = vmul.f32 0.35355338, %v617_v26 }
 0x19f   : > { %v833_v31 = vmul.f32 0.35355338, %v609_v27  ;;  %v560_v32 = vpop.f32.mrb[5].mxu0  ;;  %v592_v33 = vpop.f32.mrb[5].mxu1  ;;  %v4840_v40 = vadd.f32 %v3699_v28, %v4770_v57  ;;  %v4852_v44 = vadd.f32 %v3707_v29, %v4770_v57 }
 0x1a0   : > { %3568 = vst [vmem:[%s4826_s28 + $0x8] sm:$0xff] %v3089_v24   ;;  %3572 = vst [vmem:[%s4826_s28 + $0x28] sm:$0xff] %v3109_v25   ;;  %v3700_v34 = vpop.f32.mrb[6].mxu0  ;;  %v3708_v35 = vpop.f32.mrb[6].mxu1  ;;  %v3104_v36 = vpack.c.bf16 %v841_v30, %v840_v21  ;;  %v4843_v41 = vadd.f32 %v4770_v57, %v560_v32  ;;  %v4863_v47 = vadd.f32 %v4770_v57, %v592_v33 }
 0x1a1   : > { %v3084_v37 = vpack.c.bf16 %v833_v31, %v832_v14  ;;  %724 = vrot.lane.b32.xlu0 %v4774_v61, %s4444_s19  ;;  %662 = vrot.lane.b32.xlu1 %v4789_v7, %s4443_s29  ;;  %v563_v38 = vpop.f32.mrb[7].mxu0  ;;  %v595_v39 = vpop.f32.mrb[7].mxu1  ;;  %v4846_v42 = vadd.f32 %v3700_v34, %v4770_v57  ;;  %v614_v45 = vsel %vm607_vm0, %v4840_v40, 0.0  ;;  %v4866_v48 = vadd.f32 %v3708_v35, %v4770_v57 }
 0x1a2   : > { %3571 = vst [vmem:[%s4826_s28 + $0x20] sm:$0xff] %v3104_v36   ;;  %v4849_v43 = vadd.f32 %v4770_v57, %v563_v38  ;;  %v612_v46 = vsel %vm607_vm0, %v4843_v41, 0.0  ;;  %v838_v49 = vmul.f32 0.35355338, %v614_v45  ;;  %v622_v55 = vsel %vm607_vm0, %v4852_v44, 0.0 }
 0x1a3   : > { %3085 = vst [vmem:[%s4826_s28] sm:$0xff] %v3084_v37   ;;  %v836_v50 = vmul.f32 0.35355338, %v612_v46  ;;  %v615_v51 = vsel %vm607_vm0, %v4846_v42, 0.0  ;;  %v620_v56 = vsel %vm607_vm0, %v4863_v47, 0.0  ;;  %v846_v58 = vmul.f32 0.35355338, %v622_v55 }
 0x1a4   : > { %v613_v52 = vsel %vm607_vm0, %v4849_v43, 0.0  ;;  %v839_v53 = vmul.f32 0.35355338, %v615_v51  ;;  %v623_v59 = vsel %vm607_vm0, %v4866_v48, 0.0  ;;  %v844_v63 = vmul.f32 0.35355338, %v620_v56 }
 0x1a5   : > { %772 = vrot.lane.b32.xlu0 %v553_v60, %s4445_s17  ;;  %710 = vrot.lane.b32.xlu1 %v4786_v6, %s4444_s19  ;;  %v837_v54 = vmul.f32 0.35355338, %v613_v52  ;;  %v4879_v60 = vadd.f32 %v4770_v57, %v595_v39  ;;  %v847_v2 = vmul.f32 0.35355338, %v623_v59  ;;  %v5005_v39 = vpack.i.bf16 %v4846_v42, %v4840_v40 }
 0x1a7   : > { %v3094_v62 = vpack.c.bf16 %v837_v54, %v836_v50  ;;  %v621_v3 = vsel %vm607_vm0, %v4879_v60, 0.0  ;;  %v3119_v4 = vpack.c.bf16 %v847_v2, %v846_v58 }
 0x1a8   : > { %v845_v5 = vmul.f32 0.35355338, %v621_v3 }
 0x1a9   : > { %788 = vrot.lane.b32.xlu0 %v4774_v61, %s4445_s17  ;;  %726 = vrot.lane.b32.xlu1 %v4789_v7, %s4444_s19  ;;  %v3099_v61 = vpack.c.bf16 %v839_v53, %v838_v49  ;;  %3569 = vst [vmem:[%s4826_s28 + $0x10] sm:$0xff] %v3094_v62   ;;  %3574 = vst [vmem:[%s4826_s28 + $0x38] sm:$0xff] %v3119_v4  }
 0x1aa   : > { %v3114_v57 = vpack.c.bf16 %v845_v5, %v844_v63 }
 0x1ab   : > { %3570 = vst [vmem:[%s4826_s28 + $0x18] sm:$0xff] %v3099_v61  }
 0x1ac   : > { %3573 = vst [vmem:[%s4826_s28 + $0x30] sm:$0xff] %v3114_v57  }
 0x1ad   : > { %774 = vrot.lane.b32.xlu1 %v4786_v6, %s4445_s17  ;;  %640 = vrot.lane.b32.xlu0 %v4777_v0, %s4443_s29  ;;  %v3917_v6 = vpack.i.bf16 %v4809_v20, %v4777_v0 }
 0x1b1   : > { %790 = vrot.lane.b32.xlu1 %v4789_v7, %s4445_s17  ;;  %656 = vrot.lane.b32.xlu0 %v4780_v1, %s4443_s29  ;;  %v3922_v7 = vpack.i.bf16 %v4806_v19, %v4780_v1 }
 0x1b5   : > { %3838 = vrot.lane.b32.xlu1 %v4815_v22, %s4446_s9  ;;  %704 = vrot.lane.b32.xlu0 %v4777_v0, %s4444_s19 }
 0x1b9   : > { %3843 = vrot.lane.b32.xlu1 %v4819_v23, %s4446_s9  ;;  %720 = vrot.lane.b32.xlu0 %v4780_v1, %s4444_s19 }
 0x1bd   : > { %3848 = vrot.lane.b32.xlu1 %v4815_v22, %s4447_s13  ;;  %768 = vrot.lane.b32.xlu0 %v4777_v0, %s4445_s17 }
 0x1c1   : > { %3853 = vrot.lane.b32.xlu1 %v4819_v23, %s4447_s13  ;;  %784 = vrot.lane.b32.xlu0 %v4780_v1, %s4445_s17 }
 0x1c5   : > { %3858 = vrot.lane.b32.xlu1 %v4815_v22, %s4448_s3  ;;  %642 = vrot.lane.b32.xlu0 %v4809_v20, %s4443_s29 }
 0x1c9   : > { %3863 = vrot.lane.b32.xlu1 %v4819_v23, %s4448_s3  ;;  %3918 = vrot.lane.b32.xlu0 %v3917_v6, %s4446_s9 }
 0x1cd   : > { %3868 = vrot.lane.b32.xlu1 %v4815_v22, %s4449_s18  ;;  %3923 = vrot.lane.b32.xlu0 %v3922_v7, %s4446_s9 }
 0x1d1   : > { %3873 = vrot.lane.b32.xlu1 %v4819_v23, %s4449_s18  ;;  %3928 = vrot.lane.b32.xlu0 %v3917_v6, %s4447_s13 }
 0x1d5   : > { %3878 = vrot.lane.b32.xlu1 %v4815_v22, %s4450_s14  ;;  %3933 = vrot.lane.b32.xlu0 %v3922_v7, %s4447_s13 }
 0x1d9   : > { %3883 = vrot.lane.b32.xlu1 %v4819_v23, %s4450_s14  ;;  %3938 = vrot.lane.b32.xlu0 %v3917_v6, %s4448_s3 }
 0x1dd   : > { %3888 = vrot.lane.b32.xlu1 %v4815_v22, %s4451_s12  ;;  %3943 = vrot.lane.b32.xlu0 %v3922_v7, %s4448_s3 }
 0x1e1   : > { %3893 = vrot.lane.b32.xlu1 %v4819_v23, %s4451_s12  ;;  %3948 = vrot.lane.b32.xlu0 %v3917_v6, %s4449_s18 }
 0x1e5   : > { %3898 = vrot.lane.b32.xlu1 %v4815_v22, %s4452_s16  ;;  %3953 = vrot.lane.b32.xlu0 %v3922_v7, %s4449_s18 }
 0x1e9   : > { %3903 = vrot.lane.b32.xlu1 %v4819_v23, %s4452_s16  ;;  %3958 = vrot.lane.b32.xlu0 %v3917_v6, %s4450_s14 }
 0x1ed   : > { %3908 = vrot.lane.b32.xlu1 %v4815_v22, %s4453_s2  ;;  %3963 = vrot.lane.b32.xlu0 %v3922_v7, %s4450_s14 }
 0x1f1   : > { %3913 = vrot.lane.b32.xlu1 %v4819_v23, %s4453_s2  ;;  %3968 = vrot.lane.b32.xlu0 %v3917_v6, %s4451_s12 }
 0x1f5   : > { %658 = vrot.lane.b32.xlu1 %v4806_v19, %s4443_s29  ;;  %3973 = vrot.lane.b32.xlu0 %v3922_v7, %s4451_s12 }
 0x1f9   : > { %706 = vrot.lane.b32.xlu1 %v4809_v20, %s4444_s19  ;;  %3978 = vrot.lane.b32.xlu0 %v3917_v6, %s4452_s16 }
 0x1fd   : > { %722 = vrot.lane.b32.xlu1 %v4806_v19, %s4444_s19  ;;  %3983 = vrot.lane.b32.xlu0 %v3922_v7, %s4452_s16 }
 0x201   : > { %770 = vrot.lane.b32.xlu1 %v4809_v20, %s4445_s17  ;;  %3988 = vrot.lane.b32.xlu0 %v3917_v6, %s4453_s2 }
 0x205   : > { %786 = vrot.lane.b32.xlu1 %v4806_v19, %s4445_s17  ;;  %3993 = vrot.lane.b32.xlu0 %v3922_v7, %s4453_s2 }
 0x209   : > { %654 = vrot.lane.b32.xlu1 %v4846_v42, %s4443_s29  ;;  %652 = vrot.lane.b32.xlu0 %v4840_v40, %s4443_s29 }
 0x20b   : > { %v661_v0 = vpop.permute.xlu0 %660  ;;  %v645_v1 = vpop.permute.xlu1 %644 }
 0x20c   : > { %v690_v8 = vsel %vm607_vm0, %v645_v1, 0.0  ;;  %v698_v14 = vsel %vm607_vm0, %v661_v0, 0.0 }
 0x20d   : > { %670 = vrot.lane.b32.xlu1 %v4866_v48, %s4443_s29  ;;  %668 = vrot.lane.b32.xlu0 %v4852_v44, %s4443_s29  ;;  %v850_v12 = vmul.f32 0.35355338, %v690_v8  ;;  %v858_v19 = vmul.f32 0.35355338, %v698_v14 }
 0x20f   : > { %v709_v9 = vpop.permute.xlu0 %708  ;;  %v647_v10 = vpop.permute.xlu1 %646 }
 0x210   : > { %v691_v11 = vsel %vm607_vm0, %v647_v10, 0.0  ;;  %v754_v21 = vsel %vm607_vm0, %v709_v9, 0.0 }
 0x211   : > { %v851_v13 = vmul.f32 0.35355338, %v691_v11  ;;  %718 = vrot.lane.b32.xlu1 %v4846_v42, %s4444_s19  ;;  %716 = vrot.lane.b32.xlu0 %v4840_v40, %s4444_s19  ;;  %v866_v26 = vmul.f32 0.35355338, %v754_v21 }
 0x213   : > { %v3129_v15 = vpack.c.bf16 %v851_v13, %v850_v12  ;;  %v725_v16 = vpop.permute.xlu0 %724  ;;  %v663_v17 = vpop.permute.xlu1 %662 }
 0x214   : > { %v699_v18 = vsel %vm607_vm0, %v663_v17, 0.0  ;;  %v762_v28 = vsel %vm607_vm0, %v725_v16, 0.0 }
 0x215   : > { %3576 = vst [vmem:[%s4826_s28 + $0x48] sm:$0xff] %v3129_v15   ;;  %v859_v20 = vmul.f32 0.35355338, %v699_v18  ;;  %734 = vrot.lane.b32.xlu1 %v4866_v48, %s4444_s19  ;;  %732 = vrot.lane.b32.xlu0 %v4852_v44, %s4444_s19  ;;  %v874_v33 = vmul.f32 0.35355338, %v762_v28 }
 0x217   : > { %v3149_v22 = vpack.c.bf16 %v859_v20, %v858_v19  ;;  %v773_v23 = vpop.permute.xlu0 %772  ;;  %v711_v24 = vpop.permute.xlu1 %710 }
 0x218   : > { %v755_v25 = vsel %vm607_vm0, %v711_v24, 0.0  ;;  %v818_v35 = vsel %vm607_vm0, %v773_v23, 0.0  ;;  %v5068_v23 = vpack.i.bf16 %v4849_v43, %v4843_v41 }
 0x219   : > { %3580 = vst [vmem:[%s4826_s28 + $0x68] sm:$0xff] %v3149_v22   ;;  %v867_v27 = vmul.f32 0.35355338, %v755_v25  ;;  %782 = vrot.lane.b32.xlu1 %v4846_v42, %s4445_s17  ;;  %780 = vrot.lane.b32.xlu0 %v4840_v40, %s4445_s17  ;;  %v882_v46 = vmul.f32 0.35355338, %v818_v35  ;;  %v5018_v40 = vpack.i.bf16 %v4866_v48, %v4852_v44 }
 0x21b   : > { %v3169_v29 = vpack.c.bf16 %v867_v27, %v866_v26  ;;  %v789_v30 = vpop.permute.xlu0 %788  ;;  %v727_v31 = vpop.permute.xlu1 %726 }
 0x21c   : > { %v763_v32 = vsel %vm607_vm0, %v727_v31, 0.0  ;;  %v826_v50 = vsel %vm607_vm0, %v789_v30, 0.0 }
 0x21d   : > { %3584 = vst [vmem:[%s4826_s28 + $0x88] sm:$0xff] %v3169_v29   ;;  %v875_v34 = vmul.f32 0.35355338, %v763_v32  ;;  %798 = vrot.lane.b32.xlu1 %v4866_v48, %s4445_s17  ;;  %796 = vrot.lane.b32.xlu0 %v4852_v44, %s4445_s17  ;;  %v890_v54 = vmul.f32 0.35355338, %v826_v50 }
 0x21f   : > { %v3189_v36 = vpack.c.bf16 %v875_v34, %v874_v33  ;;  %v775_v37 = vpop.permute.xlu1 %774  ;;  %v641_v38 = vpop.permute.xlu0 %640  ;;  %v5080_v34 = vpack.i.bf16 %v4879_v60, %v4863_v47 }
 0x220   : > { %v819_v45 = vsel %vm607_vm0, %v775_v37, 0.0  ;;  %v688_v17 = vsel %vm607_vm0, %v641_v38, 0.0 }
 0x221   : > { %3588 = vst [vmem:[%s4826_s28 + $0xa8] sm:$0xff] %v3189_v36   ;;  %v883_v49 = vmul.f32 0.35355338, %v819_v45  ;;  %3998 = vrot.lane.b32.xlu1 %v5005_v39, %s4446_s9  ;;  %648 = vrot.lane.b32.xlu0 %v4843_v41, %s4443_s29  ;;  %v848_v27 = vmul.f32 0.35355338, %v688_v17 }
 0x223   : > { %v3209_v51 = vpack.c.bf16 %v883_v49, %v882_v46  ;;  %v791_v52 = vpop.permute.xlu1 %790  ;;  %v5014_v53 = vpop.permute.xlu0 %656 }
 0x224   : > { %v827_v42 = vsel %vm607_vm0, %v791_v52, 0.0 }
 0x225   : > { %3592 = vst [vmem:[%s4826_s28 + $0xc8] sm:$0xff] %v3209_v51   ;;  %v891_v55 = vmul.f32 0.35355338, %v827_v42  ;;  %4003 = vrot.lane.b32.xlu1 %v5018_v40, %s4446_s9  ;;  %664 = vrot.lane.b32.xlu0 %v4863_v47, %s4443_s29 }
 0x227   : > { %v3229_v56 = vpack.c.bf16 %v891_v55, %v890_v54  ;;  %v3839_v58 = vpop.permute.xlu1 %3838  ;;  %v5026_v59 = vpop.permute.xlu0 %704 }
 0x228   : > { %v3841_v61 = vunpack.i.h.bf16 %v3839_v58  ;;  %v3840_v62 = vunpack.i.l.bf16 %v3839_v58 }
 0x229   : > { %3596 = vst [vmem:[%s4826_s28 + $0xe8] sm:$0xff] %v3229_v56   ;;  %4008 = vrot.lane.b32.xlu1 %v5005_v39, %s4447_s13  ;;  %712 = vrot.lane.b32.xlu0 %v4843_v41, %s4444_s19 }
 0x22a   : > { %v947_v44 = vsel %vm607_vm0, %v3841_v61, 0.0  ;;  %v946_v48 = vsel %vm607_vm0, %v3840_v62, 0.0 }
 0x22b   : > { %v3249_v63 = vpack.c.bf16 %v947_v44, %v946_v48  ;;  %v3844_v2 = vpop.permute.xlu1 %3843  ;;  %v5035_v3 = vpop.permute.xlu0 %720 }
 0x22c   : > { %v3846_v4 = vunpack.i.h.bf16 %v3844_v2  ;;  %v3845_v5 = vunpack.i.l.bf16 %v3844_v2 }
 0x22d   : > { %3599 = vst [vmem:[%s5038_s8 + $0x8] sm:$0xff] %v3249_v63   ;;  %4013 = vrot.lane.b32.xlu1 %v5018_v40, %s4447_s13  ;;  %728 = vrot.lane.b32.xlu0 %v4863_v47, %s4444_s19 }
 0x22e   : > { %v955_v57 = vsel %vm607_vm0, %v3846_v4, 0.0  ;;  %v954_v6 = vsel %vm607_vm0, %v3845_v5, 0.0 }
 0x22f   : > { %v3269_v7 = vpack.c.bf16 %v955_v57, %v954_v6  ;;  %v3849_v0 = vpop.permute.xlu1 %3848  ;;  %v5047_v1 = vpop.permute.xlu0 %768 }
 0x230   : > { %v3851_v8 = vunpack.i.h.bf16 %v3849_v0  ;;  %v3850_v9 = vunpack.i.l.bf16 %v3849_v0 }
 0x231   : > { %3603 = vst [vmem:[%s5038_s8 + $0x28] sm:$0xff] %v3269_v7   ;;  %4018 = vrot.lane.b32.xlu1 %v5005_v39, %s4448_s3  ;;  %776 = vrot.lane.b32.xlu0 %v4843_v41, %s4445_s17 }
 0x232   : > { %v1011_v10 = vsel %vm607_vm0, %v3851_v8, 0.0  ;;  %v1010_v11 = vsel %vm607_vm0, %v3850_v9, 0.0 }
 0x233   : > { %v3289_v12 = vpack.c.bf16 %v1011_v10, %v1010_v11  ;;  %v3854_v13 = vpop.permute.xlu1 %3853  ;;  %v5056_v14 = vpop.permute.xlu0 %784 }
 0x234   : > { %v3856_v15 = vunpack.i.h.bf16 %v3854_v13  ;;  %v3855_v16 = vunpack.i.l.bf16 %v3854_v13 }
 0x235   : > { %3607 = vst [vmem:[%s5038_s8 + $0x48] sm:$0xff] %v3289_v12   ;;  %4023 = vrot.lane.b32.xlu1 %v5018_v40, %s4448_s3  ;;  %792 = vrot.lane.b32.xlu0 %v4863_v47, %s4445_s17 }
 0x236   : > { %v1019_v18 = vsel %vm607_vm0, %v3856_v15, 0.0  ;;  %v1018_v19 = vsel %vm607_vm0, %v3855_v16, 0.0 }
 0x237   : > { %v3309_v20 = vpack.c.bf16 %v1019_v18, %v1018_v19  ;;  %v3859_v21 = vpop.permute.xlu1 %3858  ;;  %v643_v22 = vpop.permute.xlu0 %642 }
 0x238   : > { %v3861_v24 = vunpack.i.h.bf16 %v3859_v21  ;;  %v3860_v25 = vunpack.i.l.bf16 %v3859_v21  ;;  %v689_v26 = vsel %vm607_vm0, %v643_v22, 0.0 }
 0x239   : > { %3611 = vst [vmem:[%s5038_s8 + $0x68] sm:$0xff] %v3309_v20   ;;  %v849_v28 = vmul.f32 0.35355338, %v689_v26  ;;  %4028 = vrot.lane.b32.xlu1 %v5005_v39, %s4449_s18  ;;  %4073 = vrot.lane.b32.xlu0 %v5068_v23, %s4446_s9 }
 0x23a   : > { %v1075_v29 = vsel %vm607_vm0, %v3861_v24, 0.0  ;;  %v1074_v41 = vsel %vm607_vm0, %v3860_v25, 0.0 }
 0x23b   : > { %v3329_v30 = vpack.c.bf16 %v1075_v29, %v1074_v41  ;;  %v3124_v31 = vpack.c.bf16 %v849_v28, %v848_v27  ;;  %v3864_v32 = vpop.permute.xlu1 %3863  ;;  %v3919_v33 = vpop.permute.xlu0 %3918 }
 0x23c   : > { %v3866_v35 = vunpack.i.h.bf16 %v3864_v32  ;;  %v3865_v36 = vunpack.i.l.bf16 %v3864_v32  ;;  %v3921_v37 = vunpack.i.h.bf16 %v3919_v33  ;;  %v3920_v38 = vunpack.i.l.bf16 %v3919_v33 }
 0x23d   : > { %3615 = vst [vmem:[%s5038_s8 + $0x88] sm:$0xff] %v3329_v30   ;;  %3575 = vst [vmem:[%s4826_s28 + $0x40] sm:$0xff] %v3124_v31   ;;  %4033 = vrot.lane.b32.xlu1 %v5018_v40, %s4449_s18  ;;  %4078 = vrot.lane.b32.xlu0 %v5080_v34, %s4446_s9 }
 0x23e   : > { %v1083_v45 = vsel %vm607_vm0, %v3866_v35, 0.0  ;;  %v1082_v46 = vsel %vm607_vm0, %v3865_v36, 0.0  ;;  %v945_v47 = vsel %vm607_vm0, %v3921_v37, 0.0  ;;  %v944_v49 = vsel %vm607_vm0, %v3920_v38, 0.0 }
 0x23f   : > { %v3349_v50 = vpack.c.bf16 %v1083_v45, %v1082_v46  ;;  %v3244_v51 = vpack.c.bf16 %v945_v47, %v944_v49  ;;  %v3869_v52 = vpop.permute.xlu1 %3868  ;;  %v3924_v42 = vpop.permute.xlu0 %3923 }
 0x240   : > { %v3871_v54 = vunpack.i.h.bf16 %v3869_v52  ;;  %v3870_v55 = vunpack.i.l.bf16 %v3869_v52  ;;  %v3926_v56 = vunpack.i.h.bf16 %v3924_v42  ;;  %v3925_v58 = vunpack.i.l.bf16 %v3924_v42 }
 0x241   : > { %3619 = vst [vmem:[%s5038_s8 + $0xa8] sm:$0xff] %v3349_v50   ;;  %3245 = vst [vmem:[%s5038_s8] sm:$0xff] %v3244_v51   ;;  %4038 = vrot.lane.b32.xlu1 %v5005_v39, %s4450_s14  ;;  %4083 = vrot.lane.b32.xlu0 %v5068_v23, %s4447_s13 }
 0x242   : > { %v1139_v61 = vsel %vm607_vm0, %v3871_v54, 0.0  ;;  %v1138_v62 = vsel %vm607_vm0, %v3870_v55, 0.0  ;;  %v953_v44 = vsel %vm607_vm0, %v3926_v56, 0.0  ;;  %v952_v48 = vsel %vm607_vm0, %v3925_v58, 0.0 }
 0x243   : > { %v3369_v63 = vpack.c.bf16 %v1139_v61, %v1138_v62  ;;  %v3264_v2 = vpack.c.bf16 %v953_v44, %v952_v48  ;;  %v3874_v4 = vpop.permute.xlu1 %3873  ;;  %v3929_v5 = vpop.permute.xlu0 %3928 }
 0x244   : > { %v3876_v57 = vunpack.i.h.bf16 %v3874_v4  ;;  %v3875_v6 = vunpack.i.l.bf16 %v3874_v4  ;;  %v3931_v7 = vunpack.i.h.bf16 %v3929_v5  ;;  %v3930_v0 = vunpack.i.l.bf16 %v3929_v5 }
 0x245   : > { %3623 = vst [vmem:[%s5038_s8 + $0xc8] sm:$0xff] %v3369_v63   ;;  %3602 = vst [vmem:[%s5038_s8 + $0x20] sm:$0xff] %v3264_v2   ;;  %4043 = vrot.lane.b32.xlu1 %v5018_v40, %s4450_s14  ;;  %4088 = vrot.lane.b32.xlu0 %v5080_v34, %s4447_s13  ;;  %s4454_s13 = smov [#allocation11]  }
 0x246   : > { %v1147_v8 = vsel %vm607_vm0, %v3876_v57, 0.0  ;;  %v1146_v9 = vsel %vm607_vm0, %v3875_v6, 0.0  ;;  %v1009_v10 = vsel %vm607_vm0, %v3931_v7, 0.0  ;;  %v1008_v11 = vsel %vm607_vm0, %v3930_v0, 0.0 }
 0x247   : > { %v3389_v12 = vpack.c.bf16 %v1147_v8, %v1146_v9  ;;  %v3284_v13 = vpack.c.bf16 %v1009_v10, %v1008_v11  ;;  %v3879_v15 = vpop.permute.xlu1 %3878  ;;  %v3934_v16 = vpop.permute.xlu0 %3933 }
 0x248   : > { %v3881_v17 = vunpack.i.h.bf16 %v3879_v15  ;;  %v3880_v18 = vunpack.i.l.bf16 %v3879_v15  ;;  %v3936_v19 = vunpack.i.h.bf16 %v3934_v16  ;;  %v3935_v20 = vunpack.i.l.bf16 %v3934_v16 }
 0x249   : > { %3627 = vst [vmem:[%s5038_s8 + $0xe8] sm:$0xff] %v3389_v12   ;;  %3606 = vst [vmem:[%s5038_s8 + $0x40] sm:$0xff] %v3284_v13   ;;  %4048 = vrot.lane.b32.xlu1 %v5005_v39, %s4451_s12  ;;  %4093 = vrot.lane.b32.xlu0 %v5068_v23, %s4448_s3 }
 0x24a   : > { %v1203_v21 = vsel %vm607_vm0, %v3881_v17, 0.0  ;;  %v1202_v22 = vsel %vm607_vm0, %v3880_v18, 0.0  ;;  %v1017_v24 = vsel %vm607_vm0, %v3936_v19, 0.0  ;;  %v1016_v25 = vsel %vm607_vm0, %v3935_v20, 0.0 }
 0x24b   : > { %v3409_v26 = vpack.c.bf16 %v1203_v21, %v1202_v22  ;;  %v3304_v27 = vpack.c.bf16 %v1017_v24, %v1016_v25  ;;  %v3884_v28 = vpop.permute.xlu1 %3883  ;;  %v3939_v29 = vpop.permute.xlu0 %3938 }
 0x24c   : > { %v3886_v41 = vunpack.i.h.bf16 %v3884_v28  ;;  %v3885_v30 = vunpack.i.l.bf16 %v3884_v28  ;;  %v3941_v31 = vunpack.i.h.bf16 %v3939_v29  ;;  %v3940_v32 = vunpack.i.l.bf16 %v3939_v29 }
 0x24d   : > { %3630 = vst [vmem:[%s5123_s7 + $0x8] sm:$0xff] %v3409_v26   ;;  %3610 = vst [vmem:[%s5038_s8 + $0x60] sm:$0xff] %v3304_v27   ;;  %4053 = vrot.lane.b32.xlu1 %v5018_v40, %s4451_s12  ;;  %4098 = vrot.lane.b32.xlu0 %v5080_v34, %s4448_s3  ;;  %s4285_s3 = sshll.u32 %s4454_s13, 4  ;;  %s4286_s3 = int_to_ptr.vmem [resolvable:$false] %s4285_s3 }
 0x24e   : > { %v1211_v33 = vsel %vm607_vm0, %v3886_v41, 0.0  ;;  %v1210_v35 = vsel %vm607_vm0, %v3885_v30, 0.0  ;;  %v1073_v36 = vsel %vm607_vm0, %v3941_v31, 0.0  ;;  %v1072_v37 = vsel %vm607_vm0, %v3940_v32, 0.0 }
 0x24f   : > { %v3429_v38 = vpack.c.bf16 %v1211_v33, %v1210_v35  ;;  %v3324_v45 = vpack.c.bf16 %v1073_v36, %v1072_v37  ;;  %v3889_v46 = vpop.permute.xlu1 %3888  ;;  %v3944_v47 = vpop.permute.xlu0 %3943 }
 0x250   : > { %v3891_v49 = vunpack.i.h.bf16 %v3889_v46  ;;  %v3890_v50 = vunpack.i.l.bf16 %v3889_v46  ;;  %v3946_v51 = vunpack.i.h.bf16 %v3944_v47  ;;  %v3945_v52 = vunpack.i.l.bf16 %v3944_v47 }
 0x251   : > { %3634 = vst [vmem:[%s5123_s7 + $0x28] sm:$0xff] %v3429_v38   ;;  %3614 = vst [vmem:[%s5038_s8 + $0x80] sm:$0xff] %v3324_v45   ;;  %4058 = vrot.lane.b32.xlu1 %v5005_v39, %s4452_s16  ;;  %4103 = vrot.lane.b32.xlu0 %v5068_v23, %s4449_s18 }
 0x252   : > { %v1267_v42 = vsel %vm607_vm0, %v3891_v49, 0.0  ;;  %v1266_v54 = vsel %vm607_vm0, %v3890_v50, 0.0  ;;  %v1081_v55 = vsel %vm607_vm0, %v3946_v51, 0.0  ;;  %v1080_v56 = vsel %vm607_vm0, %v3945_v52, 0.0 }
 0x253   : > { %v3449_v58 = vpack.c.bf16 %v1267_v42, %v1266_v54  ;;  %v3344_v61 = vpack.c.bf16 %v1081_v55, %v1080_v56  ;;  %v3894_v62 = vpop.permute.xlu1 %3893  ;;  %v3949_v44 = vpop.permute.xlu0 %3948 }
 0x254   : > { %v3896_v48 = vunpack.i.h.bf16 %v3894_v62  ;;  %v3895_v63 = vunpack.i.l.bf16 %v3894_v62  ;;  %v3951_v2 = vunpack.i.h.bf16 %v3949_v44  ;;  %v3950_v4 = vunpack.i.l.bf16 %v3949_v44 }
 0x255   : > { %3638 = vst [vmem:[%s5123_s7 + $0x48] sm:$0xff] %v3449_v58   ;;  %3618 = vst [vmem:[%s5038_s8 + $0xa0] sm:$0xff] %v3344_v61   ;;  %4063 = vrot.lane.b32.xlu1 %v5018_v40, %s4452_s16  ;;  %4108 = vrot.lane.b32.xlu0 %v5080_v34, %s4449_s18  ;;  %v696_v62 = vsel %vm607_vm0, %v5014_v53, 0.0  ;;  %s4287_s18 = scalar_lea.vmem %s4286_s3, 8192 }
 0x256   : > { %v1275_v5 = vsel %vm607_vm0, %v3896_v48, 0.0  ;;  %v1274_v57 = vsel %vm607_vm0, %v3895_v63, 0.0  ;;  %v1137_v6 = vsel %vm607_vm0, %v3951_v2, 0.0  ;;  %v1136_v7 = vsel %vm607_vm0, %v3950_v4, 0.0 }
 0x257   : > { %v3469_v0 = vpack.c.bf16 %v1275_v5, %v1274_v57  ;;  %v3364_v8 = vpack.c.bf16 %v1137_v6, %v1136_v7  ;;  %v3899_v9 = vpop.permute.xlu1 %3898  ;;  %v3954_v10 = vpop.permute.xlu0 %3953 }
 0x258   : > { %v3901_v11 = vunpack.i.h.bf16 %v3899_v9  ;;  %v3900_v12 = vunpack.i.l.bf16 %v3899_v9  ;;  %v3956_v13 = vunpack.i.h.bf16 %v3954_v10  ;;  %v3955_v15 = vunpack.i.l.bf16 %v3954_v10 }
 0x259   : > { %3642 = vst [vmem:[%s5123_s7 + $0x68] sm:$0xff] %v3469_v0   ;;  %3622 = vst [vmem:[%s5038_s8 + $0xc0] sm:$0xff] %v3364_v8   ;;  %4068 = vrot.lane.b32.xlu1 %v5005_v39, %s4453_s2  ;;  %4113 = vrot.lane.b32.xlu0 %v5068_v23, %s4450_s14  ;;  %v856_v8 = vmul.f32 0.35355338, %v696_v62  ;;  %v752_v10 = vsel %vm607_vm0, %v5026_v59, 0.0  ;;  %v760_v59 = vsel %vm607_vm0, %v5035_v3, 0.0 }
 0x25a   : > { %v1331_v16 = vsel %vm607_vm0, %v3901_v11, 0.0  ;;  %v1330_v17 = vsel %vm607_vm0, %v3900_v12, 0.0  ;;  %v1145_v18 = vsel %vm607_vm0, %v3956_v13, 0.0  ;;  %v1144_v19 = vsel %vm607_vm0, %v3955_v15, 0.0 }
 0x25b   : > { %v3489_v20 = vpack.c.bf16 %v1331_v16, %v1330_v17  ;;  %v3384_v21 = vpack.c.bf16 %v1145_v18, %v1144_v19  ;;  %v3904_v22 = vpop.permute.xlu1 %3903  ;;  %v3959_v24 = vpop.permute.xlu0 %3958  ;;  %v816_v3 = vsel %vm607_vm0, %v5047_v1, 0.0  ;;  %v824_v1 = vsel %vm607_vm0, %v5056_v14, 0.0 }
 0x25c   : > { %v3906_v25 = vunpack.i.h.bf16 %v3904_v22  ;;  %v3905_v26 = vunpack.i.l.bf16 %v3904_v22  ;;  %v3961_v27 = vunpack.i.h.bf16 %v3959_v24  ;;  %v3960_v28 = vunpack.i.l.bf16 %v3959_v24 }
 0x25d   : > { %3646 = vst [vmem:[%s5123_s7 + $0x88] sm:$0xff] %v3489_v20   ;;  %3626 = vst [vmem:[%s5038_s8 + $0xe0] sm:$0xff] %v3384_v21   ;;  %650 = vrot.lane.b32.xlu1 %v4849_v43, %s4443_s29  ;;  %4118 = vrot.lane.b32.xlu0 %v5080_v34, %s4450_s14  ;;  %v864_v21 = vmul.f32 0.35355338, %v752_v10 }
 0x25e   : > { %v1339_v39 = vsel %vm607_vm0, %v3906_v25, 0.0  ;;  %v1338_v29 = vsel %vm607_vm0, %v3905_v26, 0.0  ;;  %v1201_v41 = vsel %vm607_vm0, %v3961_v27, 0.0  ;;  %v1200_v30 = vsel %vm607_vm0, %v3960_v28, 0.0 }
 0x25f   : > { %v3509_v31 = vpack.c.bf16 %v1339_v39, %v1338_v29  ;;  %v3404_v32 = vpack.c.bf16 %v1201_v41, %v1200_v30  ;;  %v3909_v33 = vpop.permute.xlu1 %3908  ;;  %v3964_v35 = vpop.permute.xlu0 %3963 }
 0x260   : > { %v3911_v36 = vunpack.i.h.bf16 %v3909_v33  ;;  %v3910_v37 = vunpack.i.l.bf16 %v3909_v33  ;;  %v3966_v38 = vunpack.i.h.bf16 %v3964_v35  ;;  %v3965_v45 = vunpack.i.l.bf16 %v3964_v35 }
 0x261   : > { %3650 = vst [vmem:[%s5123_s7 + $0xa8] sm:$0xff] %v3509_v31   ;;  %3405 = vst [vmem:[%s5123_s7] sm:$0xff] %v3404_v32   ;;  %666 = vrot.lane.b32.xlu1 %v4879_v60, %s4443_s29  ;;  %4123 = vrot.lane.b32.xlu0 %v5068_v23, %s4451_s12  ;;  %v872_v31 = vmul.f32 0.35355338, %v760_v59  ;;  %s2412_s29 = sshll.u32 %s5038_s8, 4  ;;  %s5352_s29 = int_to_ptr.vmem [resolvable:$true] %s2412_s29 }
 0x262   : > { %v1395_v46 = vsel %vm607_vm0, %v3911_v36, 0.0  ;;  %v1394_v47 = vsel %vm607_vm0, %v3910_v37, 0.0  ;;  %v1209_v49 = vsel %vm607_vm0, %v3966_v38, 0.0  ;;  %v1208_v50 = vsel %vm607_vm0, %v3965_v45, 0.0  ;;  %s4281_s9 = scalar_lea.vmem %s5352_s29, 4096  ;;  %p4288_p4 = scmp.lt.s32.totalorder %s5352_s29, %s4286_s3 }
 0x263   : > { %v3529_v51 = vpack.c.bf16 %v1395_v46, %v1394_v47  ;;  %v3424_v52 = vpack.c.bf16 %v1209_v49, %v1208_v50  ;;  %v3914_v42 = vpop.permute.xlu1 %3913  ;;  %v3969_v54 = vpop.permute.xlu0 %3968  ;;  %v880_v49 = vmul.f32 0.35355338, %v816_v3  ;;  %p4282_p2 = scmp.ne.s32.totalorder %s5352_s29, %s4281_s9  ;;  %p4289_p9 = scmp.lt.s32.totalorder %s4287_s18, %s4281_s9 }
 0x264   : > { %v3916_v55 = vunpack.i.h.bf16 %v3914_v42  ;;  %v3915_v56 = vunpack.i.l.bf16 %v3914_v42  ;;  %v3971_v58 = vunpack.i.h.bf16 %v3969_v54  ;;  %v3970_v61 = vunpack.i.l.bf16 %v3969_v54 }
 0x265   : > { %3654 = vst [vmem:[%s5123_s7 + $0xc8] sm:$0xff] %v3529_v51   ;;  %3633 = vst [vmem:[%s5123_s7 + $0x20] sm:$0xff] %v3424_v52   ;;  %714 = vrot.lane.b32.xlu1 %v4849_v43, %s4444_s19  ;;  %4128 = vrot.lane.b32.xlu0 %v5080_v34, %s4451_s12  ;;  %p4283_p10 = pnand %p4282_p2, %p5575_p6  ;;  %p4290_p5 = por %p4289_p9, %p4288_p4 }
 0x266   : > { %v1403_v44 = vsel %vm607_vm0, %v3916_v55, 0.0  ;;  %v1402_v48 = vsel %vm607_vm0, %v3915_v56, 0.0  ;;  %v1265_v63 = vsel %vm607_vm0, %v3971_v58, 0.0  ;;  %v1264_v2 = vsel %vm607_vm0, %v3970_v61, 0.0 }
 0x267   : > { %v3549_v4 = vpack.c.bf16 %v1403_v44, %v1402_v48  ;;  %v3444_v53 = vpack.c.bf16 %v1265_v63, %v1264_v2  ;;  %v659_v5 = vpop.permute.xlu1 %658  ;;  %v3974_v57 = vpop.permute.xlu0 %3973  ;;  %v888_v58 = vmul.f32 0.35355338, %v824_v1  ;;  %p4284_p3 = pneg %p4283_p10 }
 0x268   : > { %v697_v6 = vsel %vm607_vm0, %v659_v5, 0.0  ;;  %v3976_v7 = vunpack.i.h.bf16 %v3974_v57  ;;  %v3975_v0 = vunpack.i.l.bf16 %v3974_v57 }
 0x269   : > { %3658 = vst [vmem:[%s5123_s7 + $0xe8] sm:$0xff] %v3549_v4   ;;  %3637 = vst [vmem:[%s5123_s7 + $0x40] sm:$0xff] %v3444_v53   ;;  %v857_v9 = vmul.f32 0.35355338, %v697_v6  ;;  %730 = vrot.lane.b32.xlu1 %v4879_v60, %s4444_s19  ;;  %4133 = vrot.lane.b32.xlu0 %v5068_v23, %s4452_s16  ;;  %s5350_s19 = scalar_lea.hbm %s5541_s5, %s5337_s11  ;;  %p4291_p7 = pnand %p4290_p5, %p4284_p3 }
 0x26a   : > { %v1273_v11 = vsel %vm607_vm0, %v3976_v7, 0.0  ;;  %v1272_v12 = vsel %vm607_vm0, %v3975_v0, 0.0 }
 0x26b   : > { %v3144_v13 = vpack.c.bf16 %v857_v9, %v856_v8  ;;  %v3464_v15 = vpack.c.bf16 %v1273_v11, %v1272_v12  ;;  %v707_v16 = vpop.permute.xlu1 %706  ;;  %v3979_v17 = vpop.permute.xlu0 %3978 }
 0x26c   : > { %v753_v18 = vsel %vm607_vm0, %v707_v16, 0.0  ;;  %v3981_v19 = vunpack.i.h.bf16 %v3979_v17  ;;  %v3980_v20 = vunpack.i.l.bf16 %v3979_v17 }
 0x26d   : > { %3579 = vst [vmem:[%s4826_s28 + $0x60] sm:$0xff] %v3144_v13   ;;  %3641 = vst [vmem:[%s5123_s7 + $0x60] sm:$0xff] %v3464_v15   ;;  %v865_v22 = vmul.f32 0.35355338, %v753_v18  ;;  %778 = vrot.lane.b32.xlu1 %v4849_v43, %s4445_s17  ;;  %4138 = vrot.lane.b32.xlu0 %v5080_v34, %s4452_s16 }
 0x26e   : > { %v1329_v24 = vsel %vm607_vm0, %v3981_v19, 0.0  ;;  %v1328_v25 = vsel %vm607_vm0, %v3980_v20, 0.0 }
 0x26f   : > { %v3164_v26 = vpack.c.bf16 %v865_v22, %v864_v21  ;;  %v3484_v27 = vpack.c.bf16 %v1329_v24, %v1328_v25  ;;  %v723_v28 = vpop.permute.xlu1 %722  ;;  %v3984_v39 = vpop.permute.xlu0 %3983 }
 0x270   : > { %v761_v29 = vsel %vm607_vm0, %v723_v28, 0.0  ;;  %v3986_v41 = vunpack.i.h.bf16 %v3984_v39  ;;  %v3985_v30 = vunpack.i.l.bf16 %v3984_v39 }
 0x271   : > { %3583 = vst [vmem:[%s4826_s28 + $0x80] sm:$0xff] %v3164_v26   ;;  %3645 = vst [vmem:[%s5123_s7 + $0x80] sm:$0xff] %v3484_v27   ;;  %v873_v43 = vmul.f32 0.35355338, %v761_v29  ;;  %794 = vrot.lane.b32.xlu1 %v4879_v60, %s4445_s17  ;;  %4143 = vrot.lane.b32.xlu0 %v5068_v23, %s4453_s2  ;;  %s5364_s17 = scalar_lea.sflag [#allocation12], %s317_s0 }
 0x272   : > { %v1337_v32 = vsel %vm607_vm0, %v3986_v41, 0.0  ;;  %v1336_v33 = vsel %vm607_vm0, %v3985_v30, 0.0 }
 0x273   : > { %v3184_v35 = vpack.c.bf16 %v873_v43, %v872_v31  ;;  %v3504_v36 = vpack.c.bf16 %v1337_v32, %v1336_v33  ;;  %v771_v37 = vpop.permute.xlu1 %770  ;;  %v3989_v38 = vpop.permute.xlu0 %3988 }
 0x274   : > { %v817_v45 = vsel %vm607_vm0, %v771_v37, 0.0  ;;  %v3991_v46 = vunpack.i.h.bf16 %v3989_v38  ;;  %v3990_v47 = vunpack.i.l.bf16 %v3989_v38 }
 0x275   : > { %3587 = vst [vmem:[%s4826_s28 + $0xa0] sm:$0xff] %v3184_v35   ;;  %3649 = vst [vmem:[%s5123_s7 + $0xa0] sm:$0xff] %v3504_v36   ;;  %v881_v60 = vmul.f32 0.35355338, %v817_v45  ;;  %4153 = vrot.lane.b32.xlu1 %v5018_v40, %s4453_s2  ;;  %4148 = vrot.lane.b32.xlu0 %v5080_v34, %s4453_s2 }
 0x276   : > { %v1393_v23 = vsel %vm607_vm0, %v3991_v46, 0.0  ;;  %v1392_v50 = vsel %vm607_vm0, %v3990_v47, 0.0 }
 0x277   : > { %v3204_v51 = vpack.c.bf16 %v881_v60, %v880_v49  ;;  %v3524_v52 = vpack.c.bf16 %v1393_v23, %v1392_v50  ;;  %v787_v42 = vpop.permute.xlu1 %786  ;;  %v3994_v54 = vpop.permute.xlu0 %3993 }
 0x278   : > { %v825_v55 = vsel %vm607_vm0, %v787_v42, 0.0  ;;  %v3996_v56 = vunpack.i.h.bf16 %v3994_v54  ;;  %v3995_v40 = vunpack.i.l.bf16 %v3994_v54 }
 0x279   : > { %3591 = vst [vmem:[%s4826_s28 + $0xc0] sm:$0xff] %v3204_v51   ;;  %3653 = vst [vmem:[%s5123_s7 + $0xc0] sm:$0xff] %v3524_v52   ;;  %v889_v34 = vmul.f32 0.35355338, %v825_v55 }
 0x27a   : > { %v1401_v14 = vsel %vm607_vm0, %v3996_v56, 0.0  ;;  %v1400_v61 = vsel %vm607_vm0, %v3995_v40, 0.0 }
 0x27b   : > { %v3224_v62 = vpack.c.bf16 %v889_v34, %v888_v58  ;;  %v3544_v44 = vpack.c.bf16 %v1401_v14, %v1400_v61  ;;  %v655_v48 = vpop.permute.xlu1 %654  ;;  %v653_v63 = vpop.permute.xlu0 %652 }
 0x27c   : > { %v695_v2 = vsel %vm607_vm0, %v655_v48, 0.0  ;;  %v694_v4 = vsel %vm607_vm0, %v653_v63, 0.0 }
 0x27d   : > { %3595 = vst [vmem:[%s4826_s28 + $0xe0] sm:$0xff] %v3224_v62   ;;  %3657 = vst [vmem:[%s5123_s7 + $0xe0] sm:$0xff] %v3544_v44   ;;  %v855_v53 = vmul.f32 0.35355338, %v695_v2  ;;  %v854_v5 = vmul.f32 0.35355338, %v694_v4 }
 0x27f   : > { %v3139_v57 = vpack.c.bf16 %v855_v53, %v854_v5  ;;  %v671_v6 = vpop.permute.xlu1 %670  ;;  %v669_v7 = vpop.permute.xlu0 %668 }
 0x280   : > { %v703_v0 = vsel %vm607_vm0, %v671_v6, 0.0  ;;  %v702_v8 = vsel %vm607_vm0, %v669_v7, 0.0 }
 0x281   : > { %3578 = vst [vmem:[%s4826_s28 + $0x58] sm:$0xff] %v3139_v57   ;;  %v863_v9 = vmul.f32 0.35355338, %v703_v0  ;;  %v862_v10 = vmul.f32 0.35355338, %v702_v8 }
 0x283   : > { %v3159_v11 = vpack.c.bf16 %v863_v9, %v862_v10  ;;  %v719_v12 = vpop.permute.xlu1 %718  ;;  %v717_v13 = vpop.permute.xlu0 %716 }
 0x284   : > { %v759_v15 = vsel %vm607_vm0, %v719_v12, 0.0  ;;  %v758_v16 = vsel %vm607_vm0, %v717_v13, 0.0 }
 0x285   : > { %3582 = vst [vmem:[%s4826_s28 + $0x78] sm:$0xff] %v3159_v11   ;;  %v871_v17 = vmul.f32 0.35355338, %v759_v15  ;;  %v870_v18 = vmul.f32 0.35355338, %v758_v16 }
 0x287   : > { %v3179_v19 = vpack.c.bf16 %v871_v17, %v870_v18  ;;  %v735_v20 = vpop.permute.xlu1 %734  ;;  %v733_v21 = vpop.permute.xlu0 %732 }
 0x288   : > { %v767_v22 = vsel %vm607_vm0, %v735_v20, 0.0  ;;  %v766_v59 = vsel %vm607_vm0, %v733_v21, 0.0 }
 0x289   : > { %3586 = vst [vmem:[%s4826_s28 + $0x98] sm:$0xff] %v3179_v19   ;;  %v879_v24 = vmul.f32 0.35355338, %v767_v22  ;;  %v878_v25 = vmul.f32 0.35355338, %v766_v59 }
 0x28b   : > { %v3199_v26 = vpack.c.bf16 %v879_v24, %v878_v25  ;;  %v783_v27 = vpop.permute.xlu1 %782  ;;  %v781_v28 = vpop.permute.xlu0 %780 }
 0x28c   : > { %v823_v39 = vsel %vm607_vm0, %v783_v27, 0.0  ;;  %v822_v29 = vsel %vm607_vm0, %v781_v28, 0.0 }
 0x28d   : > { %3590 = vst [vmem:[%s4826_s28 + $0xb8] sm:$0xff] %v3199_v26   ;;  %v887_v41 = vmul.f32 0.35355338, %v823_v39  ;;  %v886_v30 = vmul.f32 0.35355338, %v822_v29 }
 0x28f   : > { %v3219_v31 = vpack.c.bf16 %v887_v41, %v886_v30  ;;  %v799_v43 = vpop.permute.xlu1 %798  ;;  %v797_v3 = vpop.permute.xlu0 %796 }
 0x290   : > { %v831_v32 = vsel %vm607_vm0, %v799_v43, 0.0  ;;  %v830_v33 = vsel %vm607_vm0, %v797_v3, 0.0 }
 0x291   : > { %3594 = vst [vmem:[%s4826_s28 + $0xd8] sm:$0xff] %v3219_v31   ;;  %v895_v35 = vmul.f32 0.35355338, %v831_v32  ;;  %v894_v36 = vmul.f32 0.35355338, %v830_v33 }
 0x293   : > { %v3239_v37 = vpack.c.bf16 %v895_v35, %v894_v36  ;;  %v3999_v38 = vpop.permute.xlu1 %3998  ;;  %v5265_v45 = vpop.permute.xlu0 %648 }
 0x294   : > { %v4001_v46 = vunpack.i.h.bf16 %v3999_v38  ;;  %v4000_v47 = vunpack.i.l.bf16 %v3999_v38 }
 0x295   : > { %3598 = vst [vmem:[%s4826_s28 + $0xf8] sm:$0xff] %v3239_v37  }
 0x296   : > { %v951_v49 = vsel %vm607_vm0, %v4001_v46, 0.0  ;;  %v950_v60 = vsel %vm607_vm0, %v4000_v47, 0.0 }
 0x297   : > { %v3259_v1 = vpack.c.bf16 %v951_v49, %v950_v60  ;;  %v4004_v23 = vpop.permute.xlu1 %4003  ;;  %v5270_v50 = vpop.permute.xlu0 %664 }
 0x298   : > { %v4006_v51 = vunpack.i.h.bf16 %v4004_v23  ;;  %v4005_v52 = vunpack.i.l.bf16 %v4004_v23 }
 0x299   : > { %3601 = vst [vmem:[%s5038_s8 + $0x18] sm:$0xff] %v3259_v1  }
 0x29a   : > { %v959_v42 = vsel %vm607_vm0, %v4006_v51, 0.0  ;;  %v958_v54 = vsel %vm607_vm0, %v4005_v52, 0.0 }
 0x29b   : > { %v3279_v55 = vpack.c.bf16 %v959_v42, %v958_v54  ;;  %v4009_v56 = vpop.permute.xlu1 %4008  ;;  %v5275_v40 = vpop.permute.xlu0 %712 }
 0x29c   : > { %v4011_v58 = vunpack.i.h.bf16 %v4009_v56  ;;  %v4010_v34 = vunpack.i.l.bf16 %v4009_v56 }
 0x29d   : > { %3605 = vst [vmem:[%s5038_s8 + $0x38] sm:$0xff] %v3279_v55  }
 0x29e   : > { %v1015_v14 = vsel %vm607_vm0, %v4011_v58, 0.0  ;;  %v1014_v61 = vsel %vm607_vm0, %v4010_v34, 0.0 }
 0x29f   : > { %v3299_v62 = vpack.c.bf16 %v1015_v14, %v1014_v61  ;;  %v4014_v44 = vpop.permute.xlu1 %4013  ;;  %v5280_v48 = vpop.permute.xlu0 %728 }
 0x2a0   : > { %v4016_v63 = vunpack.i.h.bf16 %v4014_v44  ;;  %v4015_v2 = vunpack.i.l.bf16 %v4014_v44 }
 0x2a1   : > { %3609 = vst [vmem:[%s5038_s8 + $0x58] sm:$0xff] %v3299_v62  }
 0x2a2   : > { %v1023_v4 = vsel %vm607_vm0, %v4016_v63, 0.0  ;;  %v1022_v53 = vsel %vm607_vm0, %v4015_v2, 0.0 }
 0x2a3   : > { %v3319_v5 = vpack.c.bf16 %v1023_v4, %v1022_v53  ;;  %v4019_v57 = vpop.permute.xlu1 %4018  ;;  %v5285_v6 = vpop.permute.xlu0 %776 }
 0x2a4   : > { %v4021_v7 = vunpack.i.h.bf16 %v4019_v57  ;;  %v4020_v0 = vunpack.i.l.bf16 %v4019_v57 }
 0x2a5   : > { %3613 = vst [vmem:[%s5038_s8 + $0x78] sm:$0xff] %v3319_v5  }
 0x2a6   : > { %v1079_v8 = vsel %vm607_vm0, %v4021_v7, 0.0  ;;  %v1078_v9 = vsel %vm607_vm0, %v4020_v0, 0.0 }
 0x2a7   : > { %v3339_v10 = vpack.c.bf16 %v1079_v8, %v1078_v9  ;;  %v4024_v11 = vpop.permute.xlu1 %4023  ;;  %v5290_v12 = vpop.permute.xlu0 %792 }
 0x2a8   : > { %v4026_v13 = vunpack.i.h.bf16 %v4024_v11  ;;  %v4025_v15 = vunpack.i.l.bf16 %v4024_v11 }
 0x2a9   : > { %3617 = vst [vmem:[%s5038_s8 + $0x98] sm:$0xff] %v3339_v10  }
 0x2aa   : > { %v1087_v16 = vsel %vm607_vm0, %v4026_v13, 0.0  ;;  %v1086_v17 = vsel %vm607_vm0, %v4025_v15, 0.0 }
 0x2ab   : > { %v3359_v18 = vpack.c.bf16 %v1087_v16, %v1086_v17  ;;  %v4029_v19 = vpop.permute.xlu1 %4028  ;;  %v4074_v20 = vpop.permute.xlu0 %4073 }
 0x2ac   : > { %v4031_v21 = vunpack.i.h.bf16 %v4029_v19  ;;  %v4030_v22 = vunpack.i.l.bf16 %v4029_v19  ;;  %v4076_v59 = vunpack.i.h.bf16 %v4074_v20  ;;  %v4075_v24 = vunpack.i.l.bf16 %v4074_v20 }
 0x2ad   : > { %3621 = vst [vmem:[%s5038_s8 + $0xb8] sm:$0xff] %v3359_v18  }
 0x2ae   : > { %v1143_v25 = vsel %vm607_vm0, %v4031_v21, 0.0  ;;  %v1142_v26 = vsel %vm607_vm0, %v4030_v22, 0.0  ;;  %v949_v27 = vsel %vm607_vm0, %v4076_v59, 0.0  ;;  %v948_v28 = vsel %vm607_vm0, %v4075_v24, 0.0 }
 0x2af   : > { %v3379_v39 = vpack.c.bf16 %v1143_v25, %v1142_v26  ;;  %v3254_v29 = vpack.c.bf16 %v949_v27, %v948_v28  ;;  %v4034_v41 = vpop.permute.xlu1 %4033  ;;  %v4079_v30 = vpop.permute.xlu0 %4078 }
 0x2b0   : > { %v4036_v31 = vunpack.i.h.bf16 %v4034_v41  ;;  %v4035_v43 = vunpack.i.l.bf16 %v4034_v41  ;;  %v4081_v3 = vunpack.i.h.bf16 %v4079_v30  ;;  %v4080_v32 = vunpack.i.l.bf16 %v4079_v30 }
 0x2b1   : > { %3625 = vst [vmem:[%s5038_s8 + $0xd8] sm:$0xff] %v3379_v39   ;;  %3600 = vst [vmem:[%s5038_s8 + $0x10] sm:$0xff] %v3254_v29  }
 0x2b2   : > { %v1151_v33 = vsel %vm607_vm0, %v4036_v31, 0.0  ;;  %v1150_v35 = vsel %vm607_vm0, %v4035_v43, 0.0  ;;  %v957_v36 = vsel %vm607_vm0, %v4081_v3, 0.0  ;;  %v956_v37 = vsel %vm607_vm0, %v4080_v32, 0.0 }
 0x2b3   : > { %v3399_v38 = vpack.c.bf16 %v1151_v33, %v1150_v35  ;;  %v3274_v46 = vpack.c.bf16 %v957_v36, %v956_v37  ;;  %v4039_v47 = vpop.permute.xlu1 %4038  ;;  %v4084_v49 = vpop.permute.xlu0 %4083 }
 0x2b4   : > { %v4041_v60 = vunpack.i.h.bf16 %v4039_v47  ;;  %v4040_v1 = vunpack.i.l.bf16 %v4039_v47  ;;  %v4086_v23 = vunpack.i.h.bf16 %v4084_v49  ;;  %v4085_v51 = vunpack.i.l.bf16 %v4084_v49 }
 0x2b5   : > { %3629 = vst [vmem:[%s5038_s8 + $0xf8] sm:$0xff] %v3399_v38   ;;  %3604 = vst [vmem:[%s5038_s8 + $0x30] sm:$0xff] %v3274_v46  }
 0x2b6   : > { %v1207_v52 = vsel %vm607_vm0, %v4041_v60, 0.0  ;;  %v1206_v42 = vsel %vm607_vm0, %v4040_v1, 0.0  ;;  %v1013_v54 = vsel %vm607_vm0, %v4086_v23, 0.0  ;;  %v1012_v55 = vsel %vm607_vm0, %v4085_v51, 0.0 }
 0x2b7   : > { %v3419_v56 = vpack.c.bf16 %v1207_v52, %v1206_v42  ;;  %v3294_v58 = vpack.c.bf16 %v1013_v54, %v1012_v55  ;;  %v4044_v34 = vpop.permute.xlu1 %4043  ;;  %v4089_v14 = vpop.permute.xlu0 %4088 }
 0x2b8   : > { %v4046_v61 = vunpack.i.h.bf16 %v4044_v34  ;;  %v4045_v62 = vunpack.i.l.bf16 %v4044_v34  ;;  %v4091_v44 = vunpack.i.h.bf16 %v4089_v14  ;;  %v4090_v63 = vunpack.i.l.bf16 %v4089_v14 }
 0x2b9   : > { %3632 = vst [vmem:[%s5123_s7 + $0x18] sm:$0xff] %v3419_v56   ;;  %3608 = vst [vmem:[%s5038_s8 + $0x50] sm:$0xff] %v3294_v58  }
 0x2ba   : > { %v1215_v2 = vsel %vm607_vm0, %v4046_v61, 0.0  ;;  %v1214_v4 = vsel %vm607_vm0, %v4045_v62, 0.0  ;;  %v1021_v53 = vsel %vm607_vm0, %v4091_v44, 0.0  ;;  %v1020_v5 = vsel %vm607_vm0, %v4090_v63, 0.0 }
 0x2bb   : > { %v3439_v57 = vpack.c.bf16 %v1215_v2, %v1214_v4  ;;  %v3314_v7 = vpack.c.bf16 %v1021_v53, %v1020_v5  ;;  %v4049_v0 = vpop.permute.xlu1 %4048  ;;  %v4094_v8 = vpop.permute.xlu0 %4093  ;;  %v692_v53 = vsel %vm607_vm0, %v5265_v45, 0.0 }
 0x2bc   : > { %v4051_v9 = vunpack.i.h.bf16 %v4049_v0  ;;  %v4050_v10 = vunpack.i.l.bf16 %v4049_v0  ;;  %v4096_v11 = vunpack.i.h.bf16 %v4094_v8  ;;  %v4095_v13 = vunpack.i.l.bf16 %v4094_v8 }
 0x2bd   : > { %3636 = vst [vmem:[%s5123_s7 + $0x38] sm:$0xff] %v3439_v57   ;;  %3612 = vst [vmem:[%s5038_s8 + $0x70] sm:$0xff] %v3314_v7  }
 0x2be   : > { %v1271_v15 = vsel %vm607_vm0, %v4051_v9, 0.0  ;;  %v1270_v16 = vsel %vm607_vm0, %v4050_v10, 0.0  ;;  %v1077_v17 = vsel %vm607_vm0, %v4096_v11, 0.0  ;;  %v1076_v18 = vsel %vm607_vm0, %v4095_v13, 0.0 }
 0x2bf   : > { %v3459_v19 = vpack.c.bf16 %v1271_v15, %v1270_v16  ;;  %v3334_v20 = vpack.c.bf16 %v1077_v17, %v1076_v18  ;;  %v4054_v21 = vpop.permute.xlu1 %4053  ;;  %v4099_v22 = vpop.permute.xlu0 %4098 }
 0x2c0   : > { %v4056_v59 = vunpack.i.h.bf16 %v4054_v21  ;;  %v4055_v24 = vunpack.i.l.bf16 %v4054_v21  ;;  %v4101_v25 = vunpack.i.h.bf16 %v4099_v22  ;;  %v4100_v26 = vunpack.i.l.bf16 %v4099_v22 }
 0x2c1   : > { %3640 = vst [vmem:[%s5123_s7 + $0x58] sm:$0xff] %v3459_v19   ;;  %3616 = vst [vmem:[%s5038_s8 + $0x90] sm:$0xff] %v3334_v20  }
 0x2c2   : > { %v1279_v27 = vsel %vm607_vm0, %v4056_v59, 0.0  ;;  %v1278_v28 = vsel %vm607_vm0, %v4055_v24, 0.0  ;;  %v1085_v39 = vsel %vm607_vm0, %v4101_v25, 0.0  ;;  %v1084_v29 = vsel %vm607_vm0, %v4100_v26, 0.0 }
 0x2c3   : > { %v3479_v41 = vpack.c.bf16 %v1279_v27, %v1278_v28  ;;  %v3354_v30 = vpack.c.bf16 %v1085_v39, %v1084_v29  ;;  %v4059_v31 = vpop.permute.xlu1 %4058  ;;  %v4104_v43 = vpop.permute.xlu0 %4103 }
 0x2c4   : > { %v4061_v3 = vunpack.i.h.bf16 %v4059_v31  ;;  %v4060_v32 = vunpack.i.l.bf16 %v4059_v31  ;;  %v4106_v33 = vunpack.i.h.bf16 %v4104_v43  ;;  %v4105_v35 = vunpack.i.l.bf16 %v4104_v43 }
 0x2c5   : > { %3644 = vst [vmem:[%s5123_s7 + $0x78] sm:$0xff] %v3479_v41   ;;  %3620 = vst [vmem:[%s5038_s8 + $0xb0] sm:$0xff] %v3354_v30  }
 0x2c6   : > { %v1335_v36 = vsel %vm607_vm0, %v4061_v3, 0.0  ;;  %v1334_v37 = vsel %vm607_vm0, %v4060_v32, 0.0  ;;  %v1141_v38 = vsel %vm607_vm0, %v4106_v33, 0.0  ;;  %v1140_v46 = vsel %vm607_vm0, %v4105_v35, 0.0 }
 0x2c7   : > { %v3499_v47 = vpack.c.bf16 %v1335_v36, %v1334_v37  ;;  %v3374_v49 = vpack.c.bf16 %v1141_v38, %v1140_v46  ;;  %v4064_v60 = vpop.permute.xlu1 %4063  ;;  %v4109_v1 = vpop.permute.xlu0 %4108 }
 0x2c8   : > { %v4066_v23 = vunpack.i.h.bf16 %v4064_v60  ;;  %v4065_v51 = vunpack.i.l.bf16 %v4064_v60  ;;  %v4111_v52 = vunpack.i.h.bf16 %v4109_v1  ;;  %v4110_v42 = vunpack.i.l.bf16 %v4109_v1 }
 0x2c9   : > { %3648 = vst [vmem:[%s5123_s7 + $0x98] sm:$0xff] %v3499_v47   ;;  %3624 = vst [vmem:[%s5038_s8 + $0xd0] sm:$0xff] %v3374_v49  }
 0x2ca   : > { %v1343_v54 = vsel %vm607_vm0, %v4066_v23, 0.0  ;;  %v1342_v55 = vsel %vm607_vm0, %v4065_v51, 0.0  ;;  %v1149_v56 = vsel %vm607_vm0, %v4111_v52, 0.0  ;;  %v1148_v58 = vsel %vm607_vm0, %v4110_v42, 0.0 }
 0x2cb   : > { %v3519_v34 = vpack.c.bf16 %v1343_v54, %v1342_v55  ;;  %v3394_v14 = vpack.c.bf16 %v1149_v56, %v1148_v58  ;;  %v4069_v61 = vpop.permute.xlu1 %4068  ;;  %v4114_v62 = vpop.permute.xlu0 %4113 }
 0x2cc   : > { %v4071_v44 = vunpack.i.h.bf16 %v4069_v61  ;;  %v4070_v63 = vunpack.i.l.bf16 %v4069_v61  ;;  %v4116_v2 = vunpack.i.h.bf16 %v4114_v62  ;;  %v4115_v4 = vunpack.i.l.bf16 %v4114_v62 }
 0x2cd   : > { %3652 = vst [vmem:[%s5123_s7 + $0xb8] sm:$0xff] %v3519_v34   ;;  %3628 = vst [vmem:[%s5038_s8 + $0xf0] sm:$0xff] %v3394_v14  }
 0x2ce   : > { %v1399_v5 = vsel %vm607_vm0, %v4071_v44, 0.0  ;;  %v1398_v57 = vsel %vm607_vm0, %v4070_v63, 0.0  ;;  %v1205_v7 = vsel %vm607_vm0, %v4116_v2, 0.0  ;;  %v1204_v0 = vsel %vm607_vm0, %v4115_v4, 0.0 }
 0x2cf   : > { %4294 = shalt.err (!%p4291_p7)
}
 0x2d0   : > { %s4295_s27 = scalar_lea.hbm %s5350_s19, 4096  ;;  %s4299_s16 = scalar_lea.hbm %s5541_s5, 8192 }
 0x2d1   : > { %p4296_p13 = scmp.ne.s32.totalorder %s5350_s19, %s4295_s27  ;;  %p4300_p1 = scmp.lt.u32.totalorder %s5350_s19, %s5541_s5 }
 0x2d2   : > { %p4301_p11 = scmp.lt.u32.totalorder %s4299_s16, %s4295_s27  ;;  %p4303_p2 = scmp.lt.u32.totalorder %s4295_s27, %s5350_s19 }
 0x2d3   : > { %p4297_p8 = pnand %p4296_p13, %p5575_p6 }
 0x2d4   : > { %p4302_p0 = por %p4301_p11, %p4300_p1 }
 0x2d5   : > { %p4298_p12 = pneg %p4297_p8 }
 0x2d6   : > { %p4304_p10 = por %p4303_p2, %p4302_p0 }
 0x2d8   : > { %p4305_p3 = pnand %p4304_p10, %p4298_p12 }
 0x2da   : > { %4308 = shalt.err (!%p4305_p3)
}
 0x2db   : > { %s4455_s24 = smov 4   ;;  %v3539_v45 = vpack.c.bf16 %v1399_v5, %v1398_v57  ;;  %v3414_v8 = vpack.c.bf16 %v1205_v7, %v1204_v0  ;;  %v651_v9 = vpop.permute.xlu1 %650  ;;  %v4119_v10 = vpop.permute.xlu0 %4118  ;;  %v852_v16 = vmul.f32 0.35355338, %v692_v53  ;;  %v700_v18 = vsel %vm607_vm0, %v5270_v50, 0.0  ;;  %s5436_s9 = scalar_lea.hbm %s5540_s4, %s5337_s11 }
 0x2dc   : > { %3738 = dma.vmem_to_hbm [thread:$0]  (%p5575_p6), %s5352_s29, 4096, %s5350_s19, %s5364_s17, %s4450_s14, %s4450_s14, %s4455_s24   ;;  %v693_v11 = vsel %vm607_vm0, %v651_v9, 0.0  ;;  %v4121_v13 = vunpack.i.h.bf16 %v4119_v10  ;;  %v4120_v15 = vunpack.i.l.bf16 %v4119_v10  ;;  %v860_v28 = vmul.f32 0.35355338, %v700_v18 }
 0x2dd   : > { %3656 = vst [vmem:[%s5123_s7 + $0xd8] sm:$0xff] %v3539_v45   ;;  %3631 = vst [vmem:[%s5123_s7 + $0x10] sm:$0xff] %v3414_v8   ;;  %v853_v17 = vmul.f32 0.35355338, %v693_v11  ;;  %v756_v50 = vsel %vm607_vm0, %v5275_v40, 0.0  ;;  %v764_v40 = vsel %vm607_vm0, %v5280_v48, 0.0 }
 0x2de   : > { %v1213_v19 = vsel %vm607_vm0, %v4121_v13, 0.0  ;;  %v1212_v20 = vsel %vm607_vm0, %v4120_v15, 0.0  ;;  %v868_v36 = vmul.f32 0.35355338, %v756_v50  ;;  %v876_v42 = vmul.f32 0.35355338, %v764_v40 }
 0x2df   : > { %v3134_v21 = vpack.c.bf16 %v853_v17, %v852_v16  ;;  %v3434_v22 = vpack.c.bf16 %v1213_v19, %v1212_v20  ;;  %v667_v59 = vpop.permute.xlu1 %666  ;;  %v4124_v24 = vpop.permute.xlu0 %4123  ;;  %v820_v48 = vsel %vm607_vm0, %v5285_v6, 0.0  ;;  %v828_v6 = vsel %vm607_vm0, %v5290_v12, 0.0  ;;  %s2394_s29 = sshll.u32 %s4826_s28, 4  ;;  %s2430_s13 = sshll.u32 %s5123_s7, 4  ;;  %s5438_s29 = int_to_ptr.vmem [resolvable:$true] %s2394_s29  ;;  %s5482_s13 = int_to_ptr.vmem [resolvable:$true] %s2430_s13 }
 0x2e0   : > { %v701_v25 = vsel %vm607_vm0, %v667_v59, 0.0  ;;  %v4126_v26 = vunpack.i.h.bf16 %v4124_v24  ;;  %v4125_v27 = vunpack.i.l.bf16 %v4124_v24  ;;  %v884_v2 = vmul.f32 0.35355338, %v820_v48  ;;  %s2369_s3 = scalar_lea.sflag [#allocation4], %s4718_s20  ;;  %s4309_s18 = scalar_lea.vmem %s5438_s29, 4096 }
 0x2e1   : > { %3577 = vst [vmem:[%s4826_s28 + $0x50] sm:$0xff] %v3134_v21   ;;  %3635 = vst [vmem:[%s5123_s7 + $0x30] sm:$0xff] %v3434_v22   ;;  %v861_v39 = vmul.f32 0.35355338, %v701_v25  ;;  %v892_v11 = vmul.f32 0.35355338, %v828_v6  ;;  %p4310_p4 = scmp.ne.s32.totalorder %s5438_s29, %s4309_s18 }
 0x2e2   : > { %v1269_v29 = vsel %vm607_vm0, %v4126_v26, 0.0  ;;  %v1268_v41 = vsel %vm607_vm0, %v4125_v27, 0.0  ;;  %s4456_s27 = smov [#allocation10]  }
 0x2e3   : > { %v3154_v30 = vpack.c.bf16 %v861_v39, %v860_v28  ;;  %v3454_v31 = vpack.c.bf16 %v1269_v29, %v1268_v41  ;;  %v715_v43 = vpop.permute.xlu1 %714  ;;  %v4129_v3 = vpop.permute.xlu0 %4128  ;;  %p4311_p9 = pnand %p4310_p4, %p5575_p6  ;;  %s4313_s0 = sshll.u32 %s4456_s27, 4  ;;  %s4314_s0 = int_to_ptr.vmem [resolvable:$false] %s4313_s0 }
 0x2e4   : > { %v757_v32 = vsel %vm607_vm0, %v715_v43, 0.0  ;;  %v4131_v33 = vunpack.i.h.bf16 %v4129_v3  ;;  %v4130_v35 = vunpack.i.l.bf16 %v4129_v3  ;;  %s4315_s12 = scalar_lea.vmem %s4314_s0, 8192  ;;  %p4316_p7 = scmp.lt.s32.totalorder %s5438_s29, %s4314_s0 }
 0x2e5   : > { %3581 = vst [vmem:[%s4826_s28 + $0x70] sm:$0xff] %v3154_v30   ;;  %3639 = vst [vmem:[%s5123_s7 + $0x50] sm:$0xff] %v3454_v31   ;;  %v869_v37 = vmul.f32 0.35355338, %v757_v32  ;;  %p4312_p5 = pneg %p4311_p9  ;;  %p4317_p13 = scmp.lt.s32.totalorder %s4315_s12, %s4309_s18 }
 0x2e6   : > { %v1277_v38 = vsel %vm607_vm0, %v4131_v33, 0.0  ;;  %v1276_v46 = vsel %vm607_vm0, %v4130_v35, 0.0 }
 0x2e7   : > { %v3174_v47 = vpack.c.bf16 %v869_v37, %v868_v36  ;;  %v3474_v49 = vpack.c.bf16 %v1277_v38, %v1276_v46  ;;  %v731_v60 = vpop.permute.xlu1 %730  ;;  %v4134_v1 = vpop.permute.xlu0 %4133  ;;  %p4318_p8 = por %p4317_p13, %p4316_p7 }
 0x2e8   : > { %v765_v23 = vsel %vm607_vm0, %v731_v60, 0.0  ;;  %v4136_v51 = vunpack.i.h.bf16 %v4134_v1  ;;  %v4135_v52 = vunpack.i.l.bf16 %v4134_v1 }
 0x2e9   : > { %3585 = vst [vmem:[%s4826_s28 + $0x90] sm:$0xff] %v3174_v47   ;;  %3643 = vst [vmem:[%s5123_s7 + $0x70] sm:$0xff] %v3474_v49   ;;  %v877_v54 = vmul.f32 0.35355338, %v765_v23  ;;  %p4319_p12 = pnand %p4318_p8, %p4312_p5 }
 0x2ea   : > { %v1333_v55 = vsel %vm607_vm0, %v4136_v51, 0.0  ;;  %v1332_v56 = vsel %vm607_vm0, %v4135_v52, 0.0 }
 0x2eb   : > { %v3194_v58 = vpack.c.bf16 %v877_v54, %v876_v42  ;;  %v3494_v34 = vpack.c.bf16 %v1333_v55, %v1332_v56  ;;  %v779_v14 = vpop.permute.xlu1 %778  ;;  %v4139_v61 = vpop.permute.xlu0 %4138 }
 0x2ec   : > { %v821_v62 = vsel %vm607_vm0, %v779_v14, 0.0  ;;  %v4141_v44 = vunpack.i.h.bf16 %v4139_v61  ;;  %v4140_v63 = vunpack.i.l.bf16 %v4139_v61 }
 0x2ed   : > { %3589 = vst [vmem:[%s4826_s28 + $0xb0] sm:$0xff] %v3194_v58   ;;  %3647 = vst [vmem:[%s5123_s7 + $0x90] sm:$0xff] %v3494_v34   ;;  %v885_v4 = vmul.f32 0.35355338, %v821_v62 }
 0x2ee   : > { %v1341_v53 = vsel %vm607_vm0, %v4141_v44, 0.0  ;;  %v1340_v5 = vsel %vm607_vm0, %v4140_v63, 0.0 }
 0x2ef   : > { %v3214_v57 = vpack.c.bf16 %v885_v4, %v884_v2  ;;  %v3514_v7 = vpack.c.bf16 %v1341_v53, %v1340_v5  ;;  %v795_v0 = vpop.permute.xlu1 %794  ;;  %v4144_v45 = vpop.permute.xlu0 %4143 }
 0x2f0   : > { %v829_v8 = vsel %vm607_vm0, %v795_v0, 0.0  ;;  %v4146_v9 = vunpack.i.h.bf16 %v4144_v45  ;;  %v4145_v10 = vunpack.i.l.bf16 %v4144_v45 }
 0x2f1   : > { %3593 = vst [vmem:[%s4826_s28 + $0xd0] sm:$0xff] %v3214_v57   ;;  %3651 = vst [vmem:[%s5123_s7 + $0xb0] sm:$0xff] %v3514_v7   ;;  %v893_v12 = vmul.f32 0.35355338, %v829_v8 }
 0x2f2   : > { %v1397_v13 = vsel %vm607_vm0, %v4146_v9, 0.0  ;;  %v1396_v15 = vsel %vm607_vm0, %v4145_v10, 0.0 }
 0x2f3   : > { %v3234_v16 = vpack.c.bf16 %v893_v12, %v892_v11  ;;  %v3534_v17 = vpack.c.bf16 %v1397_v13, %v1396_v15  ;;  %v4154_v18 = vpop.permute.xlu1 %4153  ;;  %v4149_v19 = vpop.permute.xlu0 %4148 }
 0x2f4   : > { %v4156_v20 = vunpack.i.h.bf16 %v4154_v18  ;;  %v4155_v21 = vunpack.i.l.bf16 %v4154_v18  ;;  %v4151_v22 = vunpack.i.h.bf16 %v4149_v19  ;;  %v4150_v59 = vunpack.i.l.bf16 %v4149_v19 }
 0x2f5   : > { %3597 = vst [vmem:[%s4826_s28 + $0xf0] sm:$0xff] %v3234_v16   ;;  %3655 = vst [vmem:[%s5123_s7 + $0xd0] sm:$0xff] %v3534_v17  }
 0x2f6   : > { %v1407_v24 = vsel %vm607_vm0, %v4156_v20, 0.0  ;;  %v1406_v25 = vsel %vm607_vm0, %v4155_v21, 0.0  ;;  %v1405_v26 = vsel %vm607_vm0, %v4151_v22, 0.0  ;;  %v1404_v27 = vsel %vm607_vm0, %v4150_v59, 0.0 }
 0x2f7   : > { %4322 = shalt.err (!%p4319_p12)
}
 0x2f8   : > { %s4323_s28 = scalar_lea.hbm %s5436_s9, 4096  ;;  %s4327_s8 = scalar_lea.hbm %s5540_s4, 8192 }
 0x2f9   : > { %p4324_p1 = scmp.ne.s32.totalorder %s5436_s9, %s4323_s28  ;;  %p4328_p2 = scmp.lt.u32.totalorder %s5436_s9, %s5540_s4 }
 0x2fa   : > { %p4329_p10 = scmp.lt.u32.totalorder %s4327_s8, %s4323_s28  ;;  %p4331_p4 = scmp.lt.u32.totalorder %s4323_s28, %s5436_s9 }
 0x2fb   : > { %p4325_p11 = pnand %p4324_p1, %p5575_p6 }
 0x2fc   : > { %p4330_p3 = por %p4329_p10, %p4328_p2 }
 0x2fd   : > { %p4326_p0 = pneg %p4325_p11 }
 0x2fe   : > { %p4332_p9 = por %p4331_p4, %p4330_p3 }
 0x300   : > { %p4333_p5 = pnand %p4332_p9, %p4326_p0 }
 0x302   : > { %4336 = shalt.err (!%p4333_p5)
}
 0x303   : > { %3737 = dma.vmem_to_hbm [thread:$0]  (%p5575_p6), %s5438_s29, 4096, %s5436_s9, %s2369_s3, %s4450_s14, %s4450_s14, %s4455_s24   ;;  %v3559_v28 = vpack.c.bf16 %v1407_v24, %v1406_v25  ;;  %v3554_v39 = vpack.c.bf16 %v1405_v26, %v1404_v27 }
 0x304   : > { %s5478_s0 = scalar_lea.hbm %s5542_s6, %s5337_s11  ;;  %s4337_s20 = scalar_lea.vmem %s5482_s13, 4096 }
 0x305   : > { %3660 = vst [vmem:[%s5123_s7 + $0xf8] sm:$0xff] %v3559_v28   ;;  %3659 = vst [vmem:[%s5123_s7 + $0xf0] sm:$0xff] %v3554_v39   ;;  %p4338_p7 = scmp.ne.s32.totalorder %s5482_s13, %s4337_s20  ;;  %s4457_s29 = smov [#allocation13]  }
 0x306   : > { %s4341_s9 = sshll.u32 %s4457_s29, 4  ;;  %s4342_s9 = int_to_ptr.vmem [resolvable:$false] %s4341_s9 }
 0x307   : > { %p4339_p13 = pnand %p4338_p7, %p5575_p6  ;;  %s4343_s3 = scalar_lea.vmem %s4342_s9, 8192 }
 0x308   : > { %p4344_p12 = scmp.lt.s32.totalorder %s5482_s13, %s4342_s9  ;;  %p4345_p1 = scmp.lt.s32.totalorder %s4343_s3, %s4337_s20 }
 0x309   : > { %p4340_p8 = pneg %p4339_p13 }
 0x30a   : > { %p4346_p11 = por %p4345_p1, %p4344_p12 }
 0x30c   : > { %p4347_p0 = pnand %p4346_p11, %p4340_p8 }
 0x30e   : > { %4350 = shalt.err (!%p4347_p0)
}
 0x30f   : > { %s4351_s7 = scalar_lea.hbm %s5478_s0, 4096  ;;  %s4355_s28 = scalar_lea.hbm %s5542_s6, 8192 }
 0x310   : > { %p4352_p2 = scmp.ne.s32.totalorder %s5478_s0, %s4351_s7  ;;  %p4356_p4 = scmp.lt.u32.totalorder %s5478_s0, %s5542_s6 }
 0x311   : > { %p4357_p9 = scmp.lt.u32.totalorder %s4355_s28, %s4351_s7  ;;  %p4359_p7 = scmp.lt.u32.totalorder %s4351_s7, %s5478_s0 }
 0x312   : > { %p4353_p10 = pnand %p4352_p2, %p5575_p6 }
 0x313   : > { %p4358_p5 = por %p4357_p9, %p4356_p4 }
 0x314   : > { %p4354_p3 = pneg %p4353_p10 }
 0x315   : > { %p4360_p13 = por %p4359_p7, %p4358_p5 }
 0x317   : > { %p4361_p8 = pnand %p4360_p13, %p4354_p3 }
 0x319   : > { %4364 = shalt.err (!%p4361_p8)
}
 0x31a   : > { %3739 = dma.vmem_to_hbm [thread:$0]  (%p5575_p6), %s5482_s13, 4096, %s5478_s0, %s5364_s17, %s4450_s14, %s4450_s14, %s4455_s24  }
 0x31b PF: > { %s2445_s8 = sand.u32 1, %s4415_s21   ;;  %p5576_p12 = scmp.ne.s32.totalorder %s5555_s30, 0 }
 0x31c   : > { %p5577_p1 = scmp.ge.s32.totalorder %s4435_s26, 2  ;;  %s2446_s15 = scalar_lea.sflag [#allocation4], %s2445_s8 }
 0x31e   : > { %p3758_p11 = pnand %p5577_p1, %p5576_p12 }
 0x320   : > { %4406 = dma.done.wait (!%p3758_p11), %s2446_s15, 4096  }
 0x321   : > { %4408 = vsyncadd (!%p3758_p11), %s2446_s15, 4294963200  ;;  %s5578_s10 = sadd.s32 4294967294, %s4435_s26  }
 0x322   : > { %s2454_s19 = sand.u32 1, %s5578_s10  }
 0x323   : > { %s2455_s18 = scalar_lea.sflag [#allocation12], %s2454_s19 }
 0x324   : > { %4410 = dma.done.wait (!%p3758_p11), %s2455_s18, 8192  }
 0x325   : > { %4412 = vsyncadd (!%p3758_p11), %s2455_s18, 4294959104  ;;  %s30_s26 = sadd.s32 1, %s4435_s26   ;;  %s5579_s14 = sld [smem:[#allocation21_spill]] }
 0x326   : > { %p27_p6 = scmp.ge.s32.totalorder %s30_s26, 4   ;;  %s5580_s17 = sld [smem:[#allocation20_spill]] }
 0x327   : > { %s5581_s21 = smov %s4419_s22  ;;  %s5582_s22 = smov %s4423_s23 }
 0x328   : > { %s5584_s24 = smov %s4431_s25  ;;  %29 = sbr.rel (!%p27_p6) target bundleno = 15 (0xf), region = 134 }
 0x32b   : > { %s5583_s23 = smov %s5579_s14 }
 0x32c   : > { %s5585_s25 = smov %s5580_s17 }
 0x32f   :  { %2469 = vsyncpa [#allocation3], 1 }
 0x330   :  { %2471 = vsyncpa [#allocation3 + $0x1], 1 }
 0x331   :  { %2472 = vsyncpa [#allocation6], 1 }
 0x332   :  { %2474 = vsyncpa [#allocation6 + $0x1], 1 }
 0x333   :  { %2475 = vsyncpa [#allocation9], 1 }
 0x334   :  { %2476 = vsyncpa [#allocation4], 1 }
 0x335   :  { %2478 = vsyncpa [#allocation4 + $0x1], 1 }
 0x336   :  { %2479 = vsyncpa [#allocation12], 1 }
 0x337   :  { %2481 = vsyncpa [#allocation12 + $0x1], 1 }

</bundles_post_ra>
